<compile_context>
chip_gen: v5e
topology: v5e:2x2
jax: 0.10.0
libtpu: 0.0.40
codegen_flags: <defaults>
</compile_context>

<pallas_src>
import functools

import numpy as np
import jax
import jax.numpy as jnp
from jax.experimental import pallas as pl
from jax.experimental.pallas import tpu as pltpu


# ---------------------------------------------------------------------------
# Tap definitions and host-side boundary masks
# ---------------------------------------------------------------------------
_TAPS = tuple((dh, dw) for dh in (-1, 0, 1) for dw in (-1, 0, 1))


@functools.lru_cache(maxsize=None)
def _tap_masks_host(H, W):
    """(9, H*W) f32 validity masks for the 9 conv taps (SAME padding)."""
    HW = H * W
    lane = np.arange(HW)
    row = lane // W
    col = lane % W
    masks = []
    for dh, dw in _TAPS:
        ok = (row + dh >= 0) & (row + dh < H) & (col + dw >= 0) & (col + dw < W)
        masks.append(ok.astype(np.float32))
    return jnp.asarray(np.stack(masks, axis=0))


def _round_up(x, m):
    return (x + m - 1) // m * m


# ---------------------------------------------------------------------------
# In-kernel helpers (pure functions on traced VMEM values)
# ---------------------------------------------------------------------------
def _conv3x3(chans, w_ref, b_ref, cin, cout, W, masks):
    """3x3 SAME conv on per-channel (B, HW) slabs.

    chans : list of cin arrays, each (B, HW) float32
    w_ref : SMEM f32[9*cin*cout]   (flattened HWIO (3,3,cin,cout) weights)
    b_ref : SMEM f32[cout]
    masks : list of 9 (B, HW) bool arrays (tap validity), masks[4] unused
    returns: list of cout arrays, each (B, HW) float32

    Loop order: (tap, ci) outermost -> only ONE rolled+masked slab live at a
    time; it is accumulated into all cout accumulators and then discarded.
    """
    B, HW = chans[0].shape
    accs = [jnp.full((B, HW), b_ref[co], jnp.float32) for co in range(cout)]  # bias splat
    for t, (dh, dw) in enumerate(_TAPS):
        delta = dh * W + dw
        for ci in range(cin):
            if delta == 0:
                src = chans[ci]
            else:
                rolled = pltpu.roll(chans[ci], shift=(-delta) % HW, axis=1)
                src = jnp.where(masks[t], rolled, 0.0)
            for co in range(cout):
                widx = (t * cin + ci) * cout + co          # HWIO flattening
                accs[co] = accs[co] + src * w_ref[widx]    # scalar * vreg
    return accs


def _broadcast_masks(mask_ref, B, HW):
    """Hoist mask broadcast: 9 x (B, HW) bool slabs, built once per kernel call."""
    return [jnp.broadcast_to(mask_ref[t:t + 1, :] > 0.5, (B, HW)) for t in range(9)]


# ---------------------------------------------------------------------------
# Fused kernels — one grid step == one batch tile, block = (C, B_TILE, HW)
# ---------------------------------------------------------------------------
def _inv_block_fwd_kernel(mask_ref, x_ref, wf, bf, whg, bhg, o_ref,
                          *, W, c1, c2, clamp):
    _, B, HW = x_ref.shape
    masks = _broadcast_masks(mask_ref, B, HW)

    x1 = [x_ref[c].astype(jnp.float32) for c in range(c1)]
    x2 = [x_ref[c1 + c].astype(jnp.float32) for c in range(c2)]

    fx2 = _conv3x3(x2, wf, bf, c2, c1, W, masks)
    y1 = [a + b for a, b in zip(x1, fx2)]                     # y1 = x1 + F(x2)

    # Fused H|G conv on y1: first c2 outputs = H(y1), last c2 = G(y1).
    hg = _conv3x3(y1, whg, bhg, c1, 2 * c2, W, masks)
    hy1, gy1 = hg[:c2], hg[c2:]

    # s = clamp * (2*sigmoid(h) - 1) == clamp * tanh(h/2)
    y2 = [x2[c] * jnp.exp(clamp * jnp.tanh(0.5 * hy1[c])) + gy1[c]
          for c in range(c2)]

    for c in range(c1):
        o_ref[c] = y1[c].astype(o_ref.dtype)
    for c in range(c2):
        o_ref[c1 + c] = y2[c].astype(o_ref.dtype)


def _inv_block_rev_kernel(mask_ref, x_ref, wf, bf, whg, bhg, o_ref,
                          *, W, c1, c2, clamp):
    _, B, HW = x_ref.shape
    masks = _broadcast_masks(mask_ref, B, HW)

    x1 = [x_ref[c].astype(jnp.float32) for c in range(c1)]
    x2 = [x_ref[c1 + c].astype(jnp.float32) for c in range(c2)]

    # Fused H|G conv on x1.
    hg = _conv3x3(x1, whg, bhg, c1, 2 * c2, W, masks)
    hx1, gx1 = hg[:c2], hg[c2:]

    # y2 = (x2 - G(x1)) / exp(s)   with s = clamp * tanh(H(x1)/2)
    y2 = [(x2[c] - gx1[c]) * jnp.exp(-clamp * jnp.tanh(0.5 * hx1[c]))
          for c in range(c2)]
    fy2 = _conv3x3(y2, wf, bf, c2, c1, W, masks)
    y1 = [x1[c] - fy2[c] for c in range(c1)]                  # y1 = x1 - F(y2)

    for c in range(c1):
        o_ref[c] = y1[c].astype(o_ref.dtype)
    for c in range(c2):
        o_ref[c1 + c] = y2[c].astype(o_ref.dtype)


# ---------------------------------------------------------------------------
# Module wrapper
# ---------------------------------------------------------------------------
class InvBlockExpPallas:
    def __init__(self, key, channel_num, channel_split_num, clamp=1.0, spilt_mode=0):
        self.channel_num = channel_num
        self.split_len1 = channel_split_num
        self.split_len2 = channel_num - channel_split_num
        self.clamp = float(clamp)
        self.spilt_mode = spilt_mode
        kF, kG, kH = jax.random.split(key, 3)
        # synthetic subnet: one 3x3 conv (in_ch -> out_ch) + bias, HWIO weights
        self.F = self._init_subnet(kF, self.split_len2, self.split_len1)
        self.G = self._init_subnet(kG, self.split_len1, self.split_len2)
        self.H = self._init_subnet(kH, self.split_len1, self.split_len2)

    @staticmethod
    def _init_subnet(key, cin, cout):
        kw, kb = jax.random.split(key)
        w = 0.1 * jax.random.normal(kw, (3, 3, cin, cout), jnp.float32)
        b = 0.1 * jax.random.normal(kb, (cout,), jnp.float32)
        return (w, b)

    @staticmethod
    def _pick_b_tile(n):
        """Batch rows per grid step: multiple of 8, <=64, >=2 grid steps when possible."""
        n8 = _round_up(n, 8)
        if n8 <= 16:
            return n8
        return min(64, _round_up((n8 + 1) // 2, 8))

    def __call__(self, x_nchw, rev=False):
        N, C, Himg, Wimg = x_nchw.shape
        assert C == self.channel_num
        x = x_nchw
        if self.spilt_mode == 1:
            x = jnp.flip(x, axis=1)
        HW = Himg * Wimg

        # Channel-major, batch on the sublane axis: (C, N_pad, HW).
        xf = jnp.transpose(x.reshape(N, C, HW), (1, 0, 2))
        b_tile = self._pick_b_tile(N)
        n_pad = _round_up(N, b_tile)
        if n_pad != N:
            xf = jnp.pad(xf, ((0, 0), (0, n_pad - N), (0, 0)))

        masks = _tap_masks_host(Himg, Wimg)                  # (9, HW) f32, host const

        kernel_fn = _inv_block_rev_kernel if rev else _inv_block_fwd_kernel
        kernel = functools.partial(kernel_fn, W=Wimg,
                                   c1=self.split_len1, c2=self.split_len2,
                                   clamp=self.clamp)

        wF, bF = self.F
        wG, bG = self.G
        wH, bH = self.H
        # Fuse H and G (same input) into one conv with cout = 2*c2.
        wHG = jnp.concatenate([wH, wG], axis=3).reshape(-1)
        bHG = jnp.concatenate([bH, bG])

        smem = pl.BlockSpec(memory_space=pltpu.MemorySpace.SMEM)
        grid = (n_pad // b_tile,)

        out = pl.pallas_call(
            kernel,
            out_shape=jax.ShapeDtypeStruct((C, n_pad, HW), x_nchw.dtype),
            grid=grid,
            in_specs=[
                pl.BlockSpec((9, HW), lambda n: (0, 0)),            # masks (resident)
                pl.BlockSpec((C, b_tile, HW), lambda n: (0, n, 0)),  # x tile (VMEM)
                smem, smem,                                          # F: w, b
                smem, smem,                                          # fused H|G: w, b
            ],
            out_specs=pl.BlockSpec((C, b_tile, HW), lambda n: (0, n, 0)),
            compiler_params=pltpu.CompilerParams(
                dimension_semantics=("parallel",),    # v7x: 2 TCs split the batch tiles
                vmem_limit_bytes=32 * 1024 * 1024),   # covers v5e's 16 MiB scoped default
        )(masks, xf, wF.reshape(-1), bF, wHG, bHG)

        out = out[:, :N, :]
        return jnp.transpose(out, (1, 0, 2)).reshape(N, C, Himg, Wimg)

    # TODO(synk): jacobian() (sum of stashed self.s) is not implemented; only the
    # forward/reverse data paths are ported.


# ---------------------------------------------------------------------------
# Pure-JAX reference (for correctness check)
# ---------------------------------------------------------------------------
def _conv3x3_ref(x_nhwc, w, b):
    y = jax.lax.conv_general_dilated(
        x_nhwc, w, window_strides=(1, 1), padding="SAME",
        dimension_numbers=("NHWC", "HWIO", "NHWC"))
    return y + b.reshape(1, 1, 1, -1)


def inv_block_ref(x_nchw, mod: InvBlockExpPallas, rev=False):
    x1 = x_nchw[:, : mod.split_len1]
    x2 = x_nchw[:, mod.split_len1:]
    x1 = jnp.transpose(x1, (0, 2, 3, 1))
    x2 = jnp.transpose(x2, (0, 2, 3, 1))
    if not rev:
        y1 = x1 + _conv3x3_ref(x2, *mod.F)
        s = mod.clamp * (jax.nn.sigmoid(_conv3x3_ref(y1, *mod.H)) * 2.0 - 1.0)
        y2 = x2 * jnp.exp(s) + _conv3x3_ref(y1, *mod.G)
    else:
        s = mod.clamp * (jax.nn.sigmoid(_conv3x3_ref(x1, *mod.H)) * 2.0 - 1.0)
        y2 = (x2 - _conv3x3_ref(x1, *mod.G)) / jnp.exp(s)
        y1 = x1 - _conv3x3_ref(y2, *mod.F)
    y1 = jnp.transpose(y1, (0, 3, 1, 2))
    y2 = jnp.transpose(y2, (0, 3, 1, 2))
    return jnp.concatenate([y1, y2], axis=1)


# ---------------------------------------------------------------------------
if __name__ == "__main__":
    key = jax.random.PRNGKey(0)
    k_params, k_x = jax.random.split(key)

    N, C, H, W = 2, 4, 16, 16          # channel_num=4, channel_split_num=2
    x = jax.random.normal(k_x, (N, C, H, W), jnp.float32)

    block = InvBlockExpPallas(k_params, channel_num=C, channel_split_num=2,
                              clamp=1.0, spilt_mode=0)

    # forward (rev=False)
    y = jax.block_until_ready(block(x, rev=False))
    y_ref = jax.block_until_ready(inv_block_ref(x, block, rev=False))
    assert y.shape == (N, C, H, W)
    assert jnp.allclose(y, y_ref, atol=1e-4, rtol=1e-4), "fwd mismatch vs reference"

    # reverse (rev=True): check vs reference and round-trip invertibility
    x_rec = jax.block_until_ready(block(y, rev=True))
    x_rec_ref = jax.block_until_ready(inv_block_ref(y, block, rev=True))
    assert jnp.allclose(x_rec, x_rec_ref, atol=1e-4, rtol=1e-4), "rev mismatch vs reference"
    assert jnp.allclose(x_rec, x, atol=1e-3, rtol=1e-3), "round-trip mismatch"

    print("KERNEL_OK")
</pallas_src>

<mosaic_0001>
module attributes {stable_mosaic.version = 11 : i64} {
  func.func @_inv_block_fwd_kernel(%arg0: i32, %arg1: memref<9x256xf32, #tpu.memory_space<vmem>>, %arg2: memref<4x8x256xf32, #tpu.memory_space<vmem>>, %arg3: memref<36xf32, #tpu.memory_space<smem>>, %arg4: memref<2xf32, #tpu.memory_space<smem>>, %arg5: memref<72xf32, #tpu.memory_space<smem>>, %arg6: memref<4xf32, #tpu.memory_space<smem>>, %arg7: memref<4x8x256xf32, #tpu.memory_space<vmem>>) attributes {dimension_semantics = [#tpu.dimension_semantics<parallel>], iteration_bounds = array<i64: 1>, scalar_prefetch = 0 : i64, scratch_operands = 0 : i64, tpu.core_type = #tpu.core_type<tc>, window_params = [{pipeline_mode = #tpu.pipeline_mode<synchronous>, transform_indices = @transform_0, window_bounds = array<i64: 9, 256>}, {transform_indices = @transform_1, window_bounds = array<i64: 4, 8, 256>}, {transform_indices = @transform_2, window_bounds = array<i64: 36>}, {transform_indices = @transform_3, window_bounds = array<i64: 2>}, {transform_indices = @transform_4, window_bounds = array<i64: 72>}, {transform_indices = @transform_5, window_bounds = array<i64: 4>}, {transform_indices = @transform_6, window_bounds = array<i64: 4, 8, 256>}]} {
    %c0 = arith.constant 0 : index
    %c0_0 = arith.constant 0 : index
    %0 = vector.load %arg1[%c0, %c0_0] : memref<9x256xf32, #tpu.memory_space<vmem>>, vector<1x256xf32>
    %cst = arith.constant 5.000000e-01 : f32
    %1 = vector.broadcast %cst : f32 to vector<1x256xf32>
    %2 = arith.cmpf ogt, %0, %1 : vector<1x256xf32>
    %3 = vector.shape_cast %2 : vector<1x256xi1> to vector<1x256xi1>
    %4 = vector.broadcast %3 : vector<1x256xi1> to vector<8x256xi1>
    %c1 = arith.constant 1 : index
    %c0_1 = arith.constant 0 : index
    %5 = vector.load %arg1[%c1, %c0_1] : memref<9x256xf32, #tpu.memory_space<vmem>>, vector<1x256xf32>
    %cst_2 = arith.constant 5.000000e-01 : f32
    %6 = vector.broadcast %cst_2 : f32 to vector<1x256xf32>
    %7 = arith.cmpf ogt, %5, %6 : vector<1x256xf32>
    %8 = vector.shape_cast %7 : vector<1x256xi1> to vector<1x256xi1>
    %9 = vector.broadcast %8 : vector<1x256xi1> to vector<8x256xi1>
    %c2 = arith.constant 2 : index
    %c0_3 = arith.constant 0 : index
    %10 = vector.load %arg1[%c2, %c0_3] : memref<9x256xf32, #tpu.memory_space<vmem>>, vector<1x256xf32>
    %cst_4 = arith.constant 5.000000e-01 : f32
    %11 = vector.broadcast %cst_4 : f32 to vector<1x256xf32>
    %12 = arith.cmpf ogt, %10, %11 : vector<1x256xf32>
    %13 = vector.shape_cast %12 : vector<1x256xi1> to vector<1x256xi1>
    %14 = vector.broadcast %13 : vector<1x256xi1> to vector<8x256xi1>
    %c3 = arith.constant 3 : index
    %c0_5 = arith.constant 0 : index
    %15 = vector.load %arg1[%c3, %c0_5] : memref<9x256xf32, #tpu.memory_space<vmem>>, vector<1x256xf32>
    %cst_6 = arith.constant 5.000000e-01 : f32
    %16 = vector.broadcast %cst_6 : f32 to vector<1x256xf32>
    %17 = arith.cmpf ogt, %15, %16 : vector<1x256xf32>
    %18 = vector.shape_cast %17 : vector<1x256xi1> to vector<1x256xi1>
    %19 = vector.broadcast %18 : vector<1x256xi1> to vector<8x256xi1>
    %c5 = arith.constant 5 : index
    %c0_7 = arith.constant 0 : index
    %20 = vector.load %arg1[%c5, %c0_7] : memref<9x256xf32, #tpu.memory_space<vmem>>, vector<1x256xf32>
    %cst_8 = arith.constant 5.000000e-01 : f32
    %21 = vector.broadcast %cst_8 : f32 to vector<1x256xf32>
    %22 = arith.cmpf ogt, %20, %21 : vector<1x256xf32>
    %23 = vector.shape_cast %22 : vector<1x256xi1> to vector<1x256xi1>
    %24 = vector.broadcast %23 : vector<1x256xi1> to vector<8x256xi1>
    %c6 = arith.constant 6 : index
    %c0_9 = arith.constant 0 : index
    %25 = vector.load %arg1[%c6, %c0_9] : memref<9x256xf32, #tpu.memory_space<vmem>>, vector<1x256xf32>
    %cst_10 = arith.constant 5.000000e-01 : f32
    %26 = vector.broadcast %cst_10 : f32 to vector<1x256xf32>
    %27 = arith.cmpf ogt, %25, %26 : vector<1x256xf32>
    %28 = vector.shape_cast %27 : vector<1x256xi1> to vector<1x256xi1>
    %29 = vector.broadcast %28 : vector<1x256xi1> to vector<8x256xi1>
    %c7 = arith.constant 7 : index
    %c0_11 = arith.constant 0 : index
    %30 = vector.load %arg1[%c7, %c0_11] : memref<9x256xf32, #tpu.memory_space<vmem>>, vector<1x256xf32>
    %cst_12 = arith.constant 5.000000e-01 : f32
    %31 = vector.broadcast %cst_12 : f32 to vector<1x256xf32>
    %32 = arith.cmpf ogt, %30, %31 : vector<1x256xf32>
    %33 = vector.shape_cast %32 : vector<1x256xi1> to vector<1x256xi1>
    %34 = vector.broadcast %33 : vector<1x256xi1> to vector<8x256xi1>
    %c8 = arith.constant 8 : index
    %c0_13 = arith.constant 0 : index
    %35 = vector.load %arg1[%c8, %c0_13] : memref<9x256xf32, #tpu.memory_space<vmem>>, vector<1x256xf32>
    %cst_14 = arith.constant 5.000000e-01 : f32
    %36 = vector.broadcast %cst_14 : f32 to vector<1x256xf32>
    %37 = arith.cmpf ogt, %35, %36 : vector<1x256xf32>
    %38 = vector.shape_cast %37 : vector<1x256xi1> to vector<1x256xi1>
    %39 = vector.broadcast %38 : vector<1x256xi1> to vector<8x256xi1>
    %c0_15 = arith.constant 0 : index
    %c0_16 = arith.constant 0 : index
    %c0_17 = arith.constant 0 : index
    %40 = vector.load %arg2[%c0_15, %c0_16, %c0_17] : memref<4x8x256xf32, #tpu.memory_space<vmem>>, vector<1x8x256xf32>
    %41 = vector.shape_cast %40 : vector<1x8x256xf32> to vector<8x256xf32>
    %c1_18 = arith.constant 1 : index
    %c0_19 = arith.constant 0 : index
    %c0_20 = arith.constant 0 : index
    %42 = vector.load %arg2[%c1_18, %c0_19, %c0_20] : memref<4x8x256xf32, #tpu.memory_space<vmem>>, vector<1x8x256xf32>
    %43 = vector.shape_cast %42 : vector<1x8x256xf32> to vector<8x256xf32>
    %c2_21 = arith.constant 2 : index
    %c0_22 = arith.constant 0 : index
    %c0_23 = arith.constant 0 : index
    %44 = vector.load %arg2[%c2_21, %c0_22, %c0_23] : memref<4x8x256xf32, #tpu.memory_space<vmem>>, vector<1x8x256xf32>
    %45 = vector.shape_cast %44 : vector<1x8x256xf32> to vector<8x256xf32>
    %c3_24 = arith.constant 3 : index
    %c0_25 = arith.constant 0 : index
    %c0_26 = arith.constant 0 : index
    %46 = vector.load %arg2[%c3_24, %c0_25, %c0_26] : memref<4x8x256xf32, #tpu.memory_space<vmem>>, vector<1x8x256xf32>
    %47 = vector.shape_cast %46 : vector<1x8x256xf32> to vector<8x256xf32>
    %c0_27 = arith.constant 0 : index
    %48 = memref.load %arg4[%c0_27] : memref<2xf32, #tpu.memory_space<smem>>
    %49 = vector.broadcast %48 : f32 to vector<8x256xf32>
    %c1_28 = arith.constant 1 : index
    %50 = memref.load %arg4[%c1_28] : memref<2xf32, #tpu.memory_space<smem>>
    %51 = vector.broadcast %50 : f32 to vector<8x256xf32>
    %c17_i32 = arith.constant 17 : i32
    %52 = tpu.dynamic_rotate %45 by %c17_i32 dim 1 : vector<8x256xf32>, i32 -> vector<8x256xf32>
    %cst_29 = arith.constant 0.000000e+00 : f32
    %53 = vector.broadcast %cst_29 : f32 to vector<8x256xf32>
    %54 = arith.select %4, %52, %53 : vector<8x256xi1>, vector<8x256xf32>
    %c0_30 = arith.constant 0 : index
    %55 = memref.load %arg3[%c0_30] : memref<36xf32, #tpu.memory_space<smem>>
    %56 = vector.broadcast %55 : f32 to vector<8x256xf32>
    %57 = arith.mulf %54, %56 : vector<8x256xf32>
    %58 = arith.addf %49, %57 : vector<8x256xf32>
    %c1_31 = arith.constant 1 : index
    %59 = memref.load %arg3[%c1_31] : memref<36xf32, #tpu.memory_space<smem>>
    %60 = vector.broadcast %59 : f32 to vector<8x256xf32>
    %61 = arith.mulf %54, %60 : vector<8x256xf32>
    %62 = arith.addf %51, %61 : vector<8x256xf32>
    %c17_i32_32 = arith.constant 17 : i32
    %63 = tpu.dynamic_rotate %47 by %c17_i32_32 dim 1 : vector<8x256xf32>, i32 -> vector<8x256xf32>
    %cst_33 = arith.constant 0.000000e+00 : f32
    %64 = vector.broadcast %cst_33 : f32 to vector<8x256xf32>
    %65 = arith.select %4, %63, %64 : vector<8x256xi1>, vector<8x256xf32>
    %c2_34 = arith.constant 2 : index
    %66 = memref.load %arg3[%c2_34] : memref<36xf32, #tpu.memory_space<smem>>
    %67 = vector.broadcast %66 : f32 to vector<8x256xf32>
    %68 = arith.mulf %65, %67 : vector<8x256xf32>
    %69 = arith.addf %58, %68 : vector<8x256xf32>
    %c3_35 = arith.constant 3 : index
    %70 = memref.load %arg3[%c3_35] : memref<36xf32, #tpu.memory_space<smem>>
    %71 = vector.broadcast %70 : f32 to vector<8x256xf32>
    %72 = arith.mulf %65, %71 : vector<8x256xf32>
    %73 = arith.addf %62, %72 : vector<8x256xf32>
    %c16_i32 = arith.constant 16 : i32
    %74 = tpu.dynamic_rotate %45 by %c16_i32 dim 1 : vector<8x256xf32>, i32 -> vector<8x256xf32>
    %cst_36 = arith.constant 0.000000e+00 : f32
    %75 = vector.broadcast %cst_36 : f32 to vector<8x256xf32>
    %76 = arith.select %9, %74, %75 : vector<8x256xi1>, vector<8x256xf32>
    %c4 = arith.constant 4 : index
    %77 = memref.load %arg3[%c4] : memref<36xf32, #tpu.memory_space<smem>>
    %78 = vector.broadcast %77 : f32 to vector<8x256xf32>
    %79 = arith.mulf %76, %78 : vector<8x256xf32>
    %80 = arith.addf %69, %79 : vector<8x256xf32>
    %c5_37 = arith.constant 5 : index
    %81 = memref.load %arg3[%c5_37] : memref<36xf32, #tpu.memory_space<smem>>
    %82 = vector.broadcast %81 : f32 to vector<8x256xf32>
    %83 = arith.mulf %76, %82 : vector<8x256xf32>
    %84 = arith.addf %73, %83 : vector<8x256xf32>
    %c16_i32_38 = arith.constant 16 : i32
    %85 = tpu.dynamic_rotate %47 by %c16_i32_38 dim 1 : vector<8x256xf32>, i32 -> vector<8x256xf32>
    %cst_39 = arith.constant 0.000000e+00 : f32
    %86 = vector.broadcast %cst_39 : f32 to vector<8x256xf32>
    %87 = arith.select %9, %85, %86 : vector<8x256xi1>, vector<8x256xf32>
    %c6_40 = arith.constant 6 : index
    %88 = memref.load %arg3[%c6_40] : memref<36xf32, #tpu.memory_space<smem>>
    %89 = vector.broadcast %88 : f32 to vector<8x256xf32>
    %90 = arith.mulf %87, %89 : vector<8x256xf32>
    %91 = arith.addf %80, %90 : vector<8x256xf32>
    %c7_41 = arith.constant 7 : index
    %92 = memref.load %arg3[%c7_41] : memref<36xf32, #tpu.memory_space<smem>>
    %93 = vector.broadcast %92 : f32 to vector<8x256xf32>
    %94 = arith.mulf %87, %93 : vector<8x256xf32>
    %95 = arith.addf %84, %94 : vector<8x256xf32>
    %c15_i32 = arith.constant 15 : i32
    %96 = tpu.dynamic_rotate %45 by %c15_i32 dim 1 : vector<8x256xf32>, i32 -> vector<8x256xf32>
    %cst_42 = arith.constant 0.000000e+00 : f32
    %97 = vector.broadcast %cst_42 : f32 to vector<8x256xf32>
    %98 = arith.select %14, %96, %97 : vector<8x256xi1>, vector<8x256xf32>
    %c8_43 = arith.constant 8 : index
    %99 = memref.load %arg3[%c8_43] : memref<36xf32, #tpu.memory_space<smem>>
    %100 = vector.broadcast %99 : f32 to vector<8x256xf32>
    %101 = arith.mulf %98, %100 : vector<8x256xf32>
    %102 = arith.addf %91, %101 : vector<8x256xf32>
    %c9 = arith.constant 9 : index
    %103 = memref.load %arg3[%c9] : memref<36xf32, #tpu.memory_space<smem>>
    %104 = vector.broadcast %103 : f32 to vector<8x256xf32>
    %105 = arith.mulf %98, %104 : vector<8x256xf32>
    %106 = arith.addf %95, %105 : vector<8x256xf32>
    %c15_i32_44 = arith.constant 15 : i32
    %107 = tpu.dynamic_rotate %47 by %c15_i32_44 dim 1 : vector<8x256xf32>, i32 -> vector<8x256xf32>
    %cst_45 = arith.constant 0.000000e+00 : f32
    %108 = vector.broadcast %cst_45 : f32 to vector<8x256xf32>
    %109 = arith.select %14, %107, %108 : vector<8x256xi1>, vector<8x256xf32>
    %c10 = arith.constant 10 : index
    %110 = memref.load %arg3[%c10] : memref<36xf32, #tpu.memory_space<smem>>
    %111 = vector.broadcast %110 : f32 to vector<8x256xf32>
    %112 = arith.mulf %109, %111 : vector<8x256xf32>
    %113 = arith.addf %102, %112 : vector<8x256xf32>
    %c11 = arith.constant 11 : index
    %114 = memref.load %arg3[%c11] : memref<36xf32, #tpu.memory_space<smem>>
    %115 = vector.broadcast %114 : f32 to vector<8x256xf32>
    %116 = arith.mulf %109, %115 : vector<8x256xf32>
    %117 = arith.addf %106, %116 : vector<8x256xf32>
    %c1_i32 = arith.constant 1 : i32
    %118 = tpu.dynamic_rotate %45 by %c1_i32 dim 1 : vector<8x256xf32>, i32 -> vector<8x256xf32>
    %cst_46 = arith.constant 0.000000e+00 : f32
    %119 = vector.broadcast %cst_46 : f32 to vector<8x256xf32>
    %120 = arith.select %19, %118, %119 : vector<8x256xi1>, vector<8x256xf32>
    %c12 = arith.constant 12 : index
    %121 = memref.load %arg3[%c12] : memref<36xf32, #tpu.memory_space<smem>>
    %122 = vector.broadcast %121 : f32 to vector<8x256xf32>
    %123 = arith.mulf %120, %122 : vector<8x256xf32>
    %124 = arith.addf %113, %123 : vector<8x256xf32>
    %c13 = arith.constant 13 : index
    %125 = memref.load %arg3[%c13] : memref<36xf32, #tpu.memory_space<smem>>
    %126 = vector.broadcast %125 : f32 to vector<8x256xf32>
    %127 = arith.mulf %120, %126 : vector<8x256xf32>
    %128 = arith.addf %117, %127 : vector<8x256xf32>
    %c1_i32_47 = arith.constant 1 : i32
    %129 = tpu.dynamic_rotate %47 by %c1_i32_47 dim 1 : vector<8x256xf32>, i32 -> vector<8x256xf32>
    %cst_48 = arith.constant 0.000000e+00 : f32
    %130 = vector.broadcast %cst_48 : f32 to vector<8x256xf32>
    %131 = arith.select %19, %129, %130 : vector<8x256xi1>, vector<8x256xf32>
    %c14 = arith.constant 14 : index
    %132 = memref.load %arg3[%c14] : memref<36xf32, #tpu.memory_space<smem>>
    %133 = vector.broadcast %132 : f32 to vector<8x256xf32>
    %134 = arith.mulf %131, %133 : vector<8x256xf32>
    %135 = arith.addf %124, %134 : vector<8x256xf32>
    %c15 = arith.constant 15 : index
    %136 = memref.load %arg3[%c15] : memref<36xf32, #tpu.memory_space<smem>>
    %137 = vector.broadcast %136 : f32 to vector<8x256xf32>
    %138 = arith.mulf %131, %137 : vector<8x256xf32>
    %139 = arith.addf %128, %138 : vector<8x256xf32>
    %c16 = arith.constant 16 : index
    %140 = memref.load %arg3[%c16] : memref<36xf32, #tpu.memory_space<smem>>
    %141 = vector.broadcast %140 : f32 to vector<8x256xf32>
    %142 = arith.mulf %45, %141 : vector<8x256xf32>
    %143 = arith.addf %135, %142 : vector<8x256xf32>
    %c17 = arith.constant 17 : index
    %144 = memref.load %arg3[%c17] : memref<36xf32, #tpu.memory_space<smem>>
    %145 = vector.broadcast %144 : f32 to vector<8x256xf32>
    %146 = arith.mulf %45, %145 : vector<8x256xf32>
    %147 = arith.addf %139, %146 : vector<8x256xf32>
    %c18 = arith.constant 18 : index
    %148 = memref.load %arg3[%c18] : memref<36xf32, #tpu.memory_space<smem>>
    %149 = vector.broadcast %148 : f32 to vector<8x256xf32>
    %150 = arith.mulf %47, %149 : vector<8x256xf32>
    %151 = arith.addf %143, %150 : vector<8x256xf32>
    %c19 = arith.constant 19 : index
    %152 = memref.load %arg3[%c19] : memref<36xf32, #tpu.memory_space<smem>>
    %153 = vector.broadcast %152 : f32 to vector<8x256xf32>
    %154 = arith.mulf %47, %153 : vector<8x256xf32>
    %155 = arith.addf %147, %154 : vector<8x256xf32>
    %c255_i32 = arith.constant 255 : i32
    %156 = tpu.dynamic_rotate %45 by %c255_i32 dim 1 : vector<8x256xf32>, i32 -> vector<8x256xf32>
    %cst_49 = arith.constant 0.000000e+00 : f32
    %157 = vector.broadcast %cst_49 : f32 to vector<8x256xf32>
    %158 = arith.select %24, %156, %157 : vector<8x256xi1>, vector<8x256xf32>
    %c20 = arith.constant 20 : index
    %159 = memref.load %arg3[%c20] : memref<36xf32, #tpu.memory_space<smem>>
    %160 = vector.broadcast %159 : f32 to vector<8x256xf32>
    %161 = arith.mulf %158, %160 : vector<8x256xf32>
    %162 = arith.addf %151, %161 : vector<8x256xf32>
    %c21 = arith.constant 21 : index
    %163 = memref.load %arg3[%c21] : memref<36xf32, #tpu.memory_space<smem>>
    %164 = vector.broadcast %163 : f32 to vector<8x256xf32>
    %165 = arith.mulf %158, %164 : vector<8x256xf32>
    %166 = arith.addf %155, %165 : vector<8x256xf32>
    %c255_i32_50 = arith.constant 255 : i32
    %167 = tpu.dynamic_rotate %47 by %c255_i32_50 dim 1 : vector<8x256xf32>, i32 -> vector<8x256xf32>
    %cst_51 = arith.constant 0.000000e+00 : f32
    %168 = vector.broadcast %cst_51 : f32 to vector<8x256xf32>
    %169 = arith.select %24, %167, %168 : vector<8x256xi1>, vector<8x256xf32>
    %c22 = arith.constant 22 : index
    %170 = memref.load %arg3[%c22] : memref<36xf32, #tpu.memory_space<smem>>
    %171 = vector.broadcast %170 : f32 to vector<8x256xf32>
    %172 = arith.mulf %169, %171 : vector<8x256xf32>
    %173 = arith.addf %162, %172 : vector<8x256xf32>
    %c23 = arith.constant 23 : index
    %174 = memref.load %arg3[%c23] : memref<36xf32, #tpu.memory_space<smem>>
    %175 = vector.broadcast %174 : f32 to vector<8x256xf32>
    %176 = arith.mulf %169, %175 : vector<8x256xf32>
    %177 = arith.addf %166, %176 : vector<8x256xf32>
    %c241_i32 = arith.constant 241 : i32
    %178 = tpu.dynamic_rotate %45 by %c241_i32 dim 1 : vector<8x256xf32>, i32 -> vector<8x256xf32>
    %cst_52 = arith.constant 0.000000e+00 : f32
    %179 = vector.broadcast %cst_52 : f32 to vector<8x256xf32>
    %180 = arith.select %29, %178, %179 : vector<8x256xi1>, vector<8x256xf32>
    %c24 = arith.constant 24 : index
    %181 = memref.load %arg3[%c24] : memref<36xf32, #tpu.memory_space<smem>>
    %182 = vector.broadcast %181 : f32 to vector<8x256xf32>
    %183 = arith.mulf %180, %182 : vector<8x256xf32>
    %184 = arith.addf %173, %183 : vector<8x256xf32>
    %c25 = arith.constant 25 : index
    %185 = memref.load %arg3[%c25] : memref<36xf32, #tpu.memory_space<smem>>
    %186 = vector.broadcast %185 : f32 to vector<8x256xf32>
    %187 = arith.mulf %180, %186 : vector<8x256xf32>
    %188 = arith.addf %177, %187 : vector<8x256xf32>
    %c241_i32_53 = arith.constant 241 : i32
    %189 = tpu.dynamic_rotate %47 by %c241_i32_53 dim 1 : vector<8x256xf32>, i32 -> vector<8x256xf32>
    %cst_54 = arith.constant 0.000000e+00 : f32
    %190 = vector.broadcast %cst_54 : f32 to vector<8x256xf32>
    %191 = arith.select %29, %189, %190 : vector<8x256xi1>, vector<8x256xf32>
    %c26 = arith.constant 26 : index
    %192 = memref.load %arg3[%c26] : memref<36xf32, #tpu.memory_space<smem>>
    %193 = vector.broadcast %192 : f32 to vector<8x256xf32>
    %194 = arith.mulf %191, %193 : vector<8x256xf32>
    %195 = arith.addf %184, %194 : vector<8x256xf32>
    %c27 = arith.constant 27 : index
    %196 = memref.load %arg3[%c27] : memref<36xf32, #tpu.memory_space<smem>>
    %197 = vector.broadcast %196 : f32 to vector<8x256xf32>
    %198 = arith.mulf %191, %197 : vector<8x256xf32>
    %199 = arith.addf %188, %198 : vector<8x256xf32>
    %c240_i32 = arith.constant 240 : i32
    %200 = tpu.dynamic_rotate %45 by %c240_i32 dim 1 : vector<8x256xf32>, i32 -> vector<8x256xf32>
    %cst_55 = arith.constant 0.000000e+00 : f32
    %201 = vector.broadcast %cst_55 : f32 to vector<8x256xf32>
    %202 = arith.select %34, %200, %201 : vector<8x256xi1>, vector<8x256xf32>
    %c28 = arith.constant 28 : index
    %203 = memref.load %arg3[%c28] : memref<36xf32, #tpu.memory_space<smem>>
    %204 = vector.broadcast %203 : f32 to vector<8x256xf32>
    %205 = arith.mulf %202, %204 : vector<8x256xf32>
    %206 = arith.addf %195, %205 : vector<8x256xf32>
    %c29 = arith.constant 29 : index
    %207 = memref.load %arg3[%c29] : memref<36xf32, #tpu.memory_space<smem>>
    %208 = vector.broadcast %207 : f32 to vector<8x256xf32>
    %209 = arith.mulf %202, %208 : vector<8x256xf32>
    %210 = arith.addf %199, %209 : vector<8x256xf32>
    %c240_i32_56 = arith.constant 240 : i32
    %211 = tpu.dynamic_rotate %47 by %c240_i32_56 dim 1 : vector<8x256xf32>, i32 -> vector<8x256xf32>
    %cst_57 = arith.constant 0.000000e+00 : f32
    %212 = vector.broadcast %cst_57 : f32 to vector<8x256xf32>
    %213 = arith.select %34, %211, %212 : vector<8x256xi1>, vector<8x256xf32>
    %c30 = arith.constant 30 : index
    %214 = memref.load %arg3[%c30] : memref<36xf32, #tpu.memory_space<smem>>
    %215 = vector.broadcast %214 : f32 to vector<8x256xf32>
    %216 = arith.mulf %213, %215 : vector<8x256xf32>
    %217 = arith.addf %206, %216 : vector<8x256xf32>
    %c31 = arith.constant 31 : index
    %218 = memref.load %arg3[%c31] : memref<36xf32, #tpu.memory_space<smem>>
    %219 = vector.broadcast %218 : f32 to vector<8x256xf32>
    %220 = arith.mulf %213, %219 : vector<8x256xf32>
    %221 = arith.addf %210, %220 : vector<8x256xf32>
    %c239_i32 = arith.constant 239 : i32
    %222 = tpu.dynamic_rotate %45 by %c239_i32 dim 1 : vector<8x256xf32>, i32 -> vector<8x256xf32>
    %cst_58 = arith.constant 0.000000e+00 : f32
    %223 = vector.broadcast %cst_58 : f32 to vector<8x256xf32>
    %224 = arith.select %39, %222, %223 : vector<8x256xi1>, vector<8x256xf32>
    %c32 = arith.constant 32 : index
    %225 = memref.load %arg3[%c32] : memref<36xf32, #tpu.memory_space<smem>>
    %226 = vector.broadcast %225 : f32 to vector<8x256xf32>
    %227 = arith.mulf %224, %226 : vector<8x256xf32>
    %228 = arith.addf %217, %227 : vector<8x256xf32>
    %c33 = arith.constant 33 : index
    %229 = memref.load %arg3[%c33] : memref<36xf32, #tpu.memory_space<smem>>
    %230 = vector.broadcast %229 : f32 to vector<8x256xf32>
    %231 = arith.mulf %224, %230 : vector<8x256xf32>
    %232 = arith.addf %221, %231 : vector<8x256xf32>
    %c239_i32_59 = arith.constant 239 : i32
    %233 = tpu.dynamic_rotate %47 by %c239_i32_59 dim 1 : vector<8x256xf32>, i32 -> vector<8x256xf32>
    %cst_60 = arith.constant 0.000000e+00 : f32
    %234 = vector.broadcast %cst_60 : f32 to vector<8x256xf32>
    %235 = arith.select %39, %233, %234 : vector<8x256xi1>, vector<8x256xf32>
    %c34 = arith.constant 34 : index
    %236 = memref.load %arg3[%c34] : memref<36xf32, #tpu.memory_space<smem>>
    %237 = vector.broadcast %236 : f32 to vector<8x256xf32>
    %238 = arith.mulf %235, %237 : vector<8x256xf32>
    %239 = arith.addf %228, %238 : vector<8x256xf32>
    %c35 = arith.constant 35 : index
    %240 = memref.load %arg3[%c35] : memref<36xf32, #tpu.memory_space<smem>>
    %241 = vector.broadcast %240 : f32 to vector<8x256xf32>
    %242 = arith.mulf %235, %241 : vector<8x256xf32>
    %243 = arith.addf %232, %242 : vector<8x256xf32>
    %244 = arith.addf %41, %239 : vector<8x256xf32>
    %245 = arith.addf %43, %243 : vector<8x256xf32>
    %c0_61 = arith.constant 0 : index
    %246 = memref.load %arg6[%c0_61] : memref<4xf32, #tpu.memory_space<smem>>
    %247 = vector.broadcast %246 : f32 to vector<8x256xf32>
    %c1_62 = arith.constant 1 : index
    %248 = memref.load %arg6[%c1_62] : memref<4xf32, #tpu.memory_space<smem>>
    %249 = vector.broadcast %248 : f32 to vector<8x256xf32>
    %c2_63 = arith.constant 2 : index
    %250 = memref.load %arg6[%c2_63] : memref<4xf32, #tpu.memory_space<smem>>
    %251 = vector.broadcast %250 : f32 to vector<8x256xf32>
    %c3_64 = arith.constant 3 : index
    %252 = memref.load %arg6[%c3_64] : memref<4xf32, #tpu.memory_space<smem>>
    %253 = vector.broadcast %252 : f32 to vector<8x256xf32>
    %c17_i32_65 = arith.constant 17 : i32
    %254 = tpu.dynamic_rotate %244 by %c17_i32_65 dim 1 : vector<8x256xf32>, i32 -> vector<8x256xf32>
    %cst_66 = arith.constant 0.000000e+00 : f32
    %255 = vector.broadcast %cst_66 : f32 to vector<8x256xf32>
    %256 = arith.select %4, %254, %255 : vector<8x256xi1>, vector<8x256xf32>
    %c0_67 = arith.constant 0 : index
    %257 = memref.load %arg5[%c0_67] : memref<72xf32, #tpu.memory_space<smem>>
    %258 = vector.broadcast %257 : f32 to vector<8x256xf32>
    %259 = arith.mulf %256, %258 : vector<8x256xf32>
    %260 = arith.addf %247, %259 : vector<8x256xf32>
    %c1_68 = arith.constant 1 : index
    %261 = memref.load %arg5[%c1_68] : memref<72xf32, #tpu.memory_space<smem>>
    %262 = vector.broadcast %261 : f32 to vector<8x256xf32>
    %263 = arith.mulf %256, %262 : vector<8x256xf32>
    %264 = arith.addf %249, %263 : vector<8x256xf32>
    %c2_69 = arith.constant 2 : index
    %265 = memref.load %arg5[%c2_69] : memref<72xf32, #tpu.memory_space<smem>>
    %266 = vector.broadcast %265 : f32 to vector<8x256xf32>
    %267 = arith.mulf %256, %266 : vector<8x256xf32>
    %268 = arith.addf %251, %267 : vector<8x256xf32>
    %c3_70 = arith.constant 3 : index
    %269 = memref.load %arg5[%c3_70] : memref<72xf32, #tpu.memory_space<smem>>
    %270 = vector.broadcast %269 : f32 to vector<8x256xf32>
    %271 = arith.mulf %256, %270 : vector<8x256xf32>
    %272 = arith.addf %253, %271 : vector<8x256xf32>
    %c17_i32_71 = arith.constant 17 : i32
    %273 = tpu.dynamic_rotate %245 by %c17_i32_71 dim 1 : vector<8x256xf32>, i32 -> vector<8x256xf32>
    %cst_72 = arith.constant 0.000000e+00 : f32
    %274 = vector.broadcast %cst_72 : f32 to vector<8x256xf32>
    %275 = arith.select %4, %273, %274 : vector<8x256xi1>, vector<8x256xf32>
    %c4_73 = arith.constant 4 : index
    %276 = memref.load %arg5[%c4_73] : memref<72xf32, #tpu.memory_space<smem>>
    %277 = vector.broadcast %276 : f32 to vector<8x256xf32>
    %278 = arith.mulf %275, %277 : vector<8x256xf32>
    %279 = arith.addf %260, %278 : vector<8x256xf32>
    %c5_74 = arith.constant 5 : index
    %280 = memref.load %arg5[%c5_74] : memref<72xf32, #tpu.memory_space<smem>>
    %281 = vector.broadcast %280 : f32 to vector<8x256xf32>
    %282 = arith.mulf %275, %281 : vector<8x256xf32>
    %283 = arith.addf %264, %282 : vector<8x256xf32>
    %c6_75 = arith.constant 6 : index
    %284 = memref.load %arg5[%c6_75] : memref<72xf32, #tpu.memory_space<smem>>
    %285 = vector.broadcast %284 : f32 to vector<8x256xf32>
    %286 = arith.mulf %275, %285 : vector<8x256xf32>
    %287 = arith.addf %268, %286 : vector<8x256xf32>
    %c7_76 = arith.constant 7 : index
    %288 = memref.load %arg5[%c7_76] : memref<72xf32, #tpu.memory_space<smem>>
    %289 = vector.broadcast %288 : f32 to vector<8x256xf32>
    %290 = arith.mulf %275, %289 : vector<8x256xf32>
    %291 = arith.addf %272, %290 : vector<8x256xf32>
    %c16_i32_77 = arith.constant 16 : i32
    %292 = tpu.dynamic_rotate %244 by %c16_i32_77 dim 1 : vector<8x256xf32>, i32 -> vector<8x256xf32>
    %cst_78 = arith.constant 0.000000e+00 : f32
    %293 = vector.broadcast %cst_78 : f32 to vector<8x256xf32>
    %294 = arith.select %9, %292, %293 : vector<8x256xi1>, vector<8x256xf32>
    %c8_79 = arith.constant 8 : index
    %295 = memref.load %arg5[%c8_79] : memref<72xf32, #tpu.memory_space<smem>>
    %296 = vector.broadcast %295 : f32 to vector<8x256xf32>
    %297 = arith.mulf %294, %296 : vector<8x256xf32>
    %298 = arith.addf %279, %297 : vector<8x256xf32>
    %c9_80 = arith.constant 9 : index
    %299 = memref.load %arg5[%c9_80] : memref<72xf32, #tpu.memory_space<smem>>
    %300 = vector.broadcast %299 : f32 to vector<8x256xf32>
    %301 = arith.mulf %294, %300 : vector<8x256xf32>
    %302 = arith.addf %283, %301 : vector<8x256xf32>
    %c10_81 = arith.constant 10 : index
    %303 = memref.load %arg5[%c10_81] : memref<72xf32, #tpu.memory_space<smem>>
    %304 = vector.broadcast %303 : f32 to vector<8x256xf32>
    %305 = arith.mulf %294, %304 : vector<8x256xf32>
    %306 = arith.addf %287, %305 : vector<8x256xf32>
    %c11_82 = arith.constant 11 : index
    %307 = memref.load %arg5[%c11_82] : memref<72xf32, #tpu.memory_space<smem>>
    %308 = vector.broadcast %307 : f32 to vector<8x256xf32>
    %309 = arith.mulf %294, %308 : vector<8x256xf32>
    %310 = arith.addf %291, %309 : vector<8x256xf32>
    %c16_i32_83 = arith.constant 16 : i32
    %311 = tpu.dynamic_rotate %245 by %c16_i32_83 dim 1 : vector<8x256xf32>, i32 -> vector<8x256xf32>
    %cst_84 = arith.constant 0.000000e+00 : f32
    %312 = vector.broadcast %cst_84 : f32 to vector<8x256xf32>
    %313 = arith.select %9, %311, %312 : vector<8x256xi1>, vector<8x256xf32>
    %c12_85 = arith.constant 12 : index
    %314 = memref.load %arg5[%c12_85] : memref<72xf32, #tpu.memory_space<smem>>
    %315 = vector.broadcast %314 : f32 to vector<8x256xf32>
    %316 = arith.mulf %313, %315 : vector<8x256xf32>
    %317 = arith.addf %298, %316 : vector<8x256xf32>
    %c13_86 = arith.constant 13 : index
    %318 = memref.load %arg5[%c13_86] : memref<72xf32, #tpu.memory_space<smem>>
    %319 = vector.broadcast %318 : f32 to vector<8x256xf32>
    %320 = arith.mulf %313, %319 : vector<8x256xf32>
    %321 = arith.addf %302, %320 : vector<8x256xf32>
    %c14_87 = arith.constant 14 : index
    %322 = memref.load %arg5[%c14_87] : memref<72xf32, #tpu.memory_space<smem>>
    %323 = vector.broadcast %322 : f32 to vector<8x256xf32>
    %324 = arith.mulf %313, %323 : vector<8x256xf32>
    %325 = arith.addf %306, %324 : vector<8x256xf32>
    %c15_88 = arith.constant 15 : index
    %326 = memref.load %arg5[%c15_88] : memref<72xf32, #tpu.memory_space<smem>>
    %327 = vector.broadcast %326 : f32 to vector<8x256xf32>
    %328 = arith.mulf %313, %327 : vector<8x256xf32>
    %329 = arith.addf %310, %328 : vector<8x256xf32>
    %c15_i32_89 = arith.constant 15 : i32
    %330 = tpu.dynamic_rotate %244 by %c15_i32_89 dim 1 : vector<8x256xf32>, i32 -> vector<8x256xf32>
    %cst_90 = arith.constant 0.000000e+00 : f32
    %331 = vector.broadcast %cst_90 : f32 to vector<8x256xf32>
    %332 = arith.select %14, %330, %331 : vector<8x256xi1>, vector<8x256xf32>
    %c16_91 = arith.constant 16 : index
    %333 = memref.load %arg5[%c16_91] : memref<72xf32, #tpu.memory_space<smem>>
    %334 = vector.broadcast %333 : f32 to vector<8x256xf32>
    %335 = arith.mulf %332, %334 : vector<8x256xf32>
    %336 = arith.addf %317, %335 : vector<8x256xf32>
    %c17_92 = arith.constant 17 : index
    %337 = memref.load %arg5[%c17_92] : memref<72xf32, #tpu.memory_space<smem>>
    %338 = vector.broadcast %337 : f32 to vector<8x256xf32>
    %339 = arith.mulf %332, %338 : vector<8x256xf32>
    %340 = arith.addf %321, %339 : vector<8x256xf32>
    %c18_93 = arith.constant 18 : index
    %341 = memref.load %arg5[%c18_93] : memref<72xf32, #tpu.memory_space<smem>>
    %342 = vector.broadcast %341 : f32 to vector<8x256xf32>
    %343 = arith.mulf %332, %342 : vector<8x256xf32>
    %344 = arith.addf %325, %343 : vector<8x256xf32>
    %c19_94 = arith.constant 19 : index
    %345 = memref.load %arg5[%c19_94] : memref<72xf32, #tpu.memory_space<smem>>
    %346 = vector.broadcast %345 : f32 to vector<8x256xf32>
    %347 = arith.mulf %332, %346 : vector<8x256xf32>
    %348 = arith.addf %329, %347 : vector<8x256xf32>
    %c15_i32_95 = arith.constant 15 : i32
    %349 = tpu.dynamic_rotate %245 by %c15_i32_95 dim 1 : vector<8x256xf32>, i32 -> vector<8x256xf32>
    %cst_96 = arith.constant 0.000000e+00 : f32
    %350 = vector.broadcast %cst_96 : f32 to vector<8x256xf32>
    %351 = arith.select %14, %349, %350 : vector<8x256xi1>, vector<8x256xf32>
    %c20_97 = arith.constant 20 : index
    %352 = memref.load %arg5[%c20_97] : memref<72xf32, #tpu.memory_space<smem>>
    %353 = vector.broadcast %352 : f32 to vector<8x256xf32>
    %354 = arith.mulf %351, %353 : vector<8x256xf32>
    %355 = arith.addf %336, %354 : vector<8x256xf32>
    %c21_98 = arith.constant 21 : index
    %356 = memref.load %arg5[%c21_98] : memref<72xf32, #tpu.memory_space<smem>>
    %357 = vector.broadcast %356 : f32 to vector<8x256xf32>
    %358 = arith.mulf %351, %357 : vector<8x256xf32>
    %359 = arith.addf %340, %358 : vector<8x256xf32>
    %c22_99 = arith.constant 22 : index
    %360 = memref.load %arg5[%c22_99] : memref<72xf32, #tpu.memory_space<smem>>
    %361 = vector.broadcast %360 : f32 to vector<8x256xf32>
    %362 = arith.mulf %351, %361 : vector<8x256xf32>
    %363 = arith.addf %344, %362 : vector<8x256xf32>
    %c23_100 = arith.constant 23 : index
    %364 = memref.load %arg5[%c23_100] : memref<72xf32, #tpu.memory_space<smem>>
    %365 = vector.broadcast %364 : f32 to vector<8x256xf32>
    %366 = arith.mulf %351, %365 : vector<8x256xf32>
    %367 = arith.addf %348, %366 : vector<8x256xf32>
    %c1_i32_101 = arith.constant 1 : i32
    %368 = tpu.dynamic_rotate %244 by %c1_i32_101 dim 1 : vector<8x256xf32>, i32 -> vector<8x256xf32>
    %cst_102 = arith.constant 0.000000e+00 : f32
    %369 = vector.broadcast %cst_102 : f32 to vector<8x256xf32>
    %370 = arith.select %19, %368, %369 : vector<8x256xi1>, vector<8x256xf32>
    %c24_103 = arith.constant 24 : index
    %371 = memref.load %arg5[%c24_103] : memref<72xf32, #tpu.memory_space<smem>>
    %372 = vector.broadcast %371 : f32 to vector<8x256xf32>
    %373 = arith.mulf %370, %372 : vector<8x256xf32>
    %374 = arith.addf %355, %373 : vector<8x256xf32>
    %c25_104 = arith.constant 25 : index
    %375 = memref.load %arg5[%c25_104] : memref<72xf32, #tpu.memory_space<smem>>
    %376 = vector.broadcast %375 : f32 to vector<8x256xf32>
    %377 = arith.mulf %370, %376 : vector<8x256xf32>
    %378 = arith.addf %359, %377 : vector<8x256xf32>
    %c26_105 = arith.constant 26 : index
    %379 = memref.load %arg5[%c26_105] : memref<72xf32, #tpu.memory_space<smem>>
    %380 = vector.broadcast %379 : f32 to vector<8x256xf32>
    %381 = arith.mulf %370, %380 : vector<8x256xf32>
    %382 = arith.addf %363, %381 : vector<8x256xf32>
    %c27_106 = arith.constant 27 : index
    %383 = memref.load %arg5[%c27_106] : memref<72xf32, #tpu.memory_space<smem>>
    %384 = vector.broadcast %383 : f32 to vector<8x256xf32>
    %385 = arith.mulf %370, %384 : vector<8x256xf32>
    %386 = arith.addf %367, %385 : vector<8x256xf32>
    %c1_i32_107 = arith.constant 1 : i32
    %387 = tpu.dynamic_rotate %245 by %c1_i32_107 dim 1 : vector<8x256xf32>, i32 -> vector<8x256xf32>
    %cst_108 = arith.constant 0.000000e+00 : f32
    %388 = vector.broadcast %cst_108 : f32 to vector<8x256xf32>
    %389 = arith.select %19, %387, %388 : vector<8x256xi1>, vector<8x256xf32>
    %c28_109 = arith.constant 28 : index
    %390 = memref.load %arg5[%c28_109] : memref<72xf32, #tpu.memory_space<smem>>
    %391 = vector.broadcast %390 : f32 to vector<8x256xf32>
    %392 = arith.mulf %389, %391 : vector<8x256xf32>
    %393 = arith.addf %374, %392 : vector<8x256xf32>
    %c29_110 = arith.constant 29 : index
    %394 = memref.load %arg5[%c29_110] : memref<72xf32, #tpu.memory_space<smem>>
    %395 = vector.broadcast %394 : f32 to vector<8x256xf32>
    %396 = arith.mulf %389, %395 : vector<8x256xf32>
    %397 = arith.addf %378, %396 : vector<8x256xf32>
    %c30_111 = arith.constant 30 : index
    %398 = memref.load %arg5[%c30_111] : memref<72xf32, #tpu.memory_space<smem>>
    %399 = vector.broadcast %398 : f32 to vector<8x256xf32>
    %400 = arith.mulf %389, %399 : vector<8x256xf32>
    %401 = arith.addf %382, %400 : vector<8x256xf32>
    %c31_112 = arith.constant 31 : index
    %402 = memref.load %arg5[%c31_112] : memref<72xf32, #tpu.memory_space<smem>>
    %403 = vector.broadcast %402 : f32 to vector<8x256xf32>
    %404 = arith.mulf %389, %403 : vector<8x256xf32>
    %405 = arith.addf %386, %404 : vector<8x256xf32>
    %c32_113 = arith.constant 32 : index
    %406 = memref.load %arg5[%c32_113] : memref<72xf32, #tpu.memory_space<smem>>
    %407 = vector.broadcast %406 : f32 to vector<8x256xf32>
    %408 = arith.mulf %244, %407 : vector<8x256xf32>
    %409 = arith.addf %393, %408 : vector<8x256xf32>
    %c33_114 = arith.constant 33 : index
    %410 = memref.load %arg5[%c33_114] : memref<72xf32, #tpu.memory_space<smem>>
    %411 = vector.broadcast %410 : f32 to vector<8x256xf32>
    %412 = arith.mulf %244, %411 : vector<8x256xf32>
    %413 = arith.addf %397, %412 : vector<8x256xf32>
    %c34_115 = arith.constant 34 : index
    %414 = memref.load %arg5[%c34_115] : memref<72xf32, #tpu.memory_space<smem>>
    %415 = vector.broadcast %414 : f32 to vector<8x256xf32>
    %416 = arith.mulf %244, %415 : vector<8x256xf32>
    %417 = arith.addf %401, %416 : vector<8x256xf32>
    %c35_116 = arith.constant 35 : index
    %418 = memref.load %arg5[%c35_116] : memref<72xf32, #tpu.memory_space<smem>>
    %419 = vector.broadcast %418 : f32 to vector<8x256xf32>
    %420 = arith.mulf %244, %419 : vector<8x256xf32>
    %421 = arith.addf %405, %420 : vector<8x256xf32>
    %c36 = arith.constant 36 : index
    %422 = memref.load %arg5[%c36] : memref<72xf32, #tpu.memory_space<smem>>
    %423 = vector.broadcast %422 : f32 to vector<8x256xf32>
    %424 = arith.mulf %245, %423 : vector<8x256xf32>
    %425 = arith.addf %409, %424 : vector<8x256xf32>
    %c37 = arith.constant 37 : index
    %426 = memref.load %arg5[%c37] : memref<72xf32, #tpu.memory_space<smem>>
    %427 = vector.broadcast %426 : f32 to vector<8x256xf32>
    %428 = arith.mulf %245, %427 : vector<8x256xf32>
    %429 = arith.addf %413, %428 : vector<8x256xf32>
    %c38 = arith.constant 38 : index
    %430 = memref.load %arg5[%c38] : memref<72xf32, #tpu.memory_space<smem>>
    %431 = vector.broadcast %430 : f32 to vector<8x256xf32>
    %432 = arith.mulf %245, %431 : vector<8x256xf32>
    %433 = arith.addf %417, %432 : vector<8x256xf32>
    %c39 = arith.constant 39 : index
    %434 = memref.load %arg5[%c39] : memref<72xf32, #tpu.memory_space<smem>>
    %435 = vector.broadcast %434 : f32 to vector<8x256xf32>
    %436 = arith.mulf %245, %435 : vector<8x256xf32>
    %437 = arith.addf %421, %436 : vector<8x256xf32>
    %c255_i32_117 = arith.constant 255 : i32
    %438 = tpu.dynamic_rotate %244 by %c255_i32_117 dim 1 : vector<8x256xf32>, i32 -> vector<8x256xf32>
    %cst_118 = arith.constant 0.000000e+00 : f32
    %439 = vector.broadcast %cst_118 : f32 to vector<8x256xf32>
    %440 = arith.select %24, %438, %439 : vector<8x256xi1>, vector<8x256xf32>
    %c40 = arith.constant 40 : index
    %441 = memref.load %arg5[%c40] : memref<72xf32, #tpu.memory_space<smem>>
    %442 = vector.broadcast %441 : f32 to vector<8x256xf32>
    %443 = arith.mulf %440, %442 : vector<8x256xf32>
    %444 = arith.addf %425, %443 : vector<8x256xf32>
    %c41 = arith.constant 41 : index
    %445 = memref.load %arg5[%c41] : memref<72xf32, #tpu.memory_space<smem>>
    %446 = vector.broadcast %445 : f32 to vector<8x256xf32>
    %447 = arith.mulf %440, %446 : vector<8x256xf32>
    %448 = arith.addf %429, %447 : vector<8x256xf32>
    %c42 = arith.constant 42 : index
    %449 = memref.load %arg5[%c42] : memref<72xf32, #tpu.memory_space<smem>>
    %450 = vector.broadcast %449 : f32 to vector<8x256xf32>
    %451 = arith.mulf %440, %450 : vector<8x256xf32>
    %452 = arith.addf %433, %451 : vector<8x256xf32>
    %c43 = arith.constant 43 : index
    %453 = memref.load %arg5[%c43] : memref<72xf32, #tpu.memory_space<smem>>
    %454 = vector.broadcast %453 : f32 to vector<8x256xf32>
    %455 = arith.mulf %440, %454 : vector<8x256xf32>
    %456 = arith.addf %437, %455 : vector<8x256xf32>
    %c255_i32_119 = arith.constant 255 : i32
    %457 = tpu.dynamic_rotate %245 by %c255_i32_119 dim 1 : vector<8x256xf32>, i32 -> vector<8x256xf32>
    %cst_120 = arith.constant 0.000000e+00 : f32
    %458 = vector.broadcast %cst_120 : f32 to vector<8x256xf32>
    %459 = arith.select %24, %457, %458 : vector<8x256xi1>, vector<8x256xf32>
    %c44 = arith.constant 44 : index
    %460 = memref.load %arg5[%c44] : memref<72xf32, #tpu.memory_space<smem>>
    %461 = vector.broadcast %460 : f32 to vector<8x256xf32>
    %462 = arith.mulf %459, %461 : vector<8x256xf32>
    %463 = arith.addf %444, %462 : vector<8x256xf32>
    %c45 = arith.constant 45 : index
    %464 = memref.load %arg5[%c45] : memref<72xf32, #tpu.memory_space<smem>>
    %465 = vector.broadcast %464 : f32 to vector<8x256xf32>
    %466 = arith.mulf %459, %465 : vector<8x256xf32>
    %467 = arith.addf %448, %466 : vector<8x256xf32>
    %c46 = arith.constant 46 : index
    %468 = memref.load %arg5[%c46] : memref<72xf32, #tpu.memory_space<smem>>
    %469 = vector.broadcast %468 : f32 to vector<8x256xf32>
    %470 = arith.mulf %459, %469 : vector<8x256xf32>
    %471 = arith.addf %452, %470 : vector<8x256xf32>
    %c47 = arith.constant 47 : index
    %472 = memref.load %arg5[%c47] : memref<72xf32, #tpu.memory_space<smem>>
    %473 = vector.broadcast %472 : f32 to vector<8x256xf32>
    %474 = arith.mulf %459, %473 : vector<8x256xf32>
    %475 = arith.addf %456, %474 : vector<8x256xf32>
    %c241_i32_121 = arith.constant 241 : i32
    %476 = tpu.dynamic_rotate %244 by %c241_i32_121 dim 1 : vector<8x256xf32>, i32 -> vector<8x256xf32>
    %cst_122 = arith.constant 0.000000e+00 : f32
    %477 = vector.broadcast %cst_122 : f32 to vector<8x256xf32>
    %478 = arith.select %29, %476, %477 : vector<8x256xi1>, vector<8x256xf32>
    %c48 = arith.constant 48 : index
    %479 = memref.load %arg5[%c48] : memref<72xf32, #tpu.memory_space<smem>>
    %480 = vector.broadcast %479 : f32 to vector<8x256xf32>
    %481 = arith.mulf %478, %480 : vector<8x256xf32>
    %482 = arith.addf %463, %481 : vector<8x256xf32>
    %c49 = arith.constant 49 : index
    %483 = memref.load %arg5[%c49] : memref<72xf32, #tpu.memory_space<smem>>
    %484 = vector.broadcast %483 : f32 to vector<8x256xf32>
    %485 = arith.mulf %478, %484 : vector<8x256xf32>
    %486 = arith.addf %467, %485 : vector<8x256xf32>
    %c50 = arith.constant 50 : index
    %487 = memref.load %arg5[%c50] : memref<72xf32, #tpu.memory_space<smem>>
    %488 = vector.broadcast %487 : f32 to vector<8x256xf32>
    %489 = arith.mulf %478, %488 : vector<8x256xf32>
    %490 = arith.addf %471, %489 : vector<8x256xf32>
    %c51 = arith.constant 51 : index
    %491 = memref.load %arg5[%c51] : memref<72xf32, #tpu.memory_space<smem>>
    %492 = vector.broadcast %491 : f32 to vector<8x256xf32>
    %493 = arith.mulf %478, %492 : vector<8x256xf32>
    %494 = arith.addf %475, %493 : vector<8x256xf32>
    %c241_i32_123 = arith.constant 241 : i32
    %495 = tpu.dynamic_rotate %245 by %c241_i32_123 dim 1 : vector<8x256xf32>, i32 -> vector<8x256xf32>
    %cst_124 = arith.constant 0.000000e+00 : f32
    %496 = vector.broadcast %cst_124 : f32 to vector<8x256xf32>
    %497 = arith.select %29, %495, %496 : vector<8x256xi1>, vector<8x256xf32>
    %c52 = arith.constant 52 : index
    %498 = memref.load %arg5[%c52] : memref<72xf32, #tpu.memory_space<smem>>
    %499 = vector.broadcast %498 : f32 to vector<8x256xf32>
    %500 = arith.mulf %497, %499 : vector<8x256xf32>
    %501 = arith.addf %482, %500 : vector<8x256xf32>
    %c53 = arith.constant 53 : index
    %502 = memref.load %arg5[%c53] : memref<72xf32, #tpu.memory_space<smem>>
    %503 = vector.broadcast %502 : f32 to vector<8x256xf32>
    %504 = arith.mulf %497, %503 : vector<8x256xf32>
    %505 = arith.addf %486, %504 : vector<8x256xf32>
    %c54 = arith.constant 54 : index
    %506 = memref.load %arg5[%c54] : memref<72xf32, #tpu.memory_space<smem>>
    %507 = vector.broadcast %506 : f32 to vector<8x256xf32>
    %508 = arith.mulf %497, %507 : vector<8x256xf32>
    %509 = arith.addf %490, %508 : vector<8x256xf32>
    %c55 = arith.constant 55 : index
    %510 = memref.load %arg5[%c55] : memref<72xf32, #tpu.memory_space<smem>>
    %511 = vector.broadcast %510 : f32 to vector<8x256xf32>
    %512 = arith.mulf %497, %511 : vector<8x256xf32>
    %513 = arith.addf %494, %512 : vector<8x256xf32>
    %c240_i32_125 = arith.constant 240 : i32
    %514 = tpu.dynamic_rotate %244 by %c240_i32_125 dim 1 : vector<8x256xf32>, i32 -> vector<8x256xf32>
    %cst_126 = arith.constant 0.000000e+00 : f32
    %515 = vector.broadcast %cst_126 : f32 to vector<8x256xf32>
    %516 = arith.select %34, %514, %515 : vector<8x256xi1>, vector<8x256xf32>
    %c56 = arith.constant 56 : index
    %517 = memref.load %arg5[%c56] : memref<72xf32, #tpu.memory_space<smem>>
    %518 = vector.broadcast %517 : f32 to vector<8x256xf32>
    %519 = arith.mulf %516, %518 : vector<8x256xf32>
    %520 = arith.addf %501, %519 : vector<8x256xf32>
    %c57 = arith.constant 57 : index
    %521 = memref.load %arg5[%c57] : memref<72xf32, #tpu.memory_space<smem>>
    %522 = vector.broadcast %521 : f32 to vector<8x256xf32>
    %523 = arith.mulf %516, %522 : vector<8x256xf32>
    %524 = arith.addf %505, %523 : vector<8x256xf32>
    %c58 = arith.constant 58 : index
    %525 = memref.load %arg5[%c58] : memref<72xf32, #tpu.memory_space<smem>>
    %526 = vector.broadcast %525 : f32 to vector<8x256xf32>
    %527 = arith.mulf %516, %526 : vector<8x256xf32>
    %528 = arith.addf %509, %527 : vector<8x256xf32>
    %c59 = arith.constant 59 : index
    %529 = memref.load %arg5[%c59] : memref<72xf32, #tpu.memory_space<smem>>
    %530 = vector.broadcast %529 : f32 to vector<8x256xf32>
    %531 = arith.mulf %516, %530 : vector<8x256xf32>
    %532 = arith.addf %513, %531 : vector<8x256xf32>
    %c240_i32_127 = arith.constant 240 : i32
    %533 = tpu.dynamic_rotate %245 by %c240_i32_127 dim 1 : vector<8x256xf32>, i32 -> vector<8x256xf32>
    %cst_128 = arith.constant 0.000000e+00 : f32
    %534 = vector.broadcast %cst_128 : f32 to vector<8x256xf32>
    %535 = arith.select %34, %533, %534 : vector<8x256xi1>, vector<8x256xf32>
    %c60 = arith.constant 60 : index
    %536 = memref.load %arg5[%c60] : memref<72xf32, #tpu.memory_space<smem>>
    %537 = vector.broadcast %536 : f32 to vector<8x256xf32>
    %538 = arith.mulf %535, %537 : vector<8x256xf32>
    %539 = arith.addf %520, %538 : vector<8x256xf32>
    %c61 = arith.constant 61 : index
    %540 = memref.load %arg5[%c61] : memref<72xf32, #tpu.memory_space<smem>>
    %541 = vector.broadcast %540 : f32 to vector<8x256xf32>
    %542 = arith.mulf %535, %541 : vector<8x256xf32>
    %543 = arith.addf %524, %542 : vector<8x256xf32>
    %c62 = arith.constant 62 : index
    %544 = memref.load %arg5[%c62] : memref<72xf32, #tpu.memory_space<smem>>
    %545 = vector.broadcast %544 : f32 to vector<8x256xf32>
    %546 = arith.mulf %535, %545 : vector<8x256xf32>
    %547 = arith.addf %528, %546 : vector<8x256xf32>
    %c63 = arith.constant 63 : index
    %548 = memref.load %arg5[%c63] : memref<72xf32, #tpu.memory_space<smem>>
    %549 = vector.broadcast %548 : f32 to vector<8x256xf32>
    %550 = arith.mulf %535, %549 : vector<8x256xf32>
    %551 = arith.addf %532, %550 : vector<8x256xf32>
    %c239_i32_129 = arith.constant 239 : i32
    %552 = tpu.dynamic_rotate %244 by %c239_i32_129 dim 1 : vector<8x256xf32>, i32 -> vector<8x256xf32>
    %cst_130 = arith.constant 0.000000e+00 : f32
    %553 = vector.broadcast %cst_130 : f32 to vector<8x256xf32>
    %554 = arith.select %39, %552, %553 : vector<8x256xi1>, vector<8x256xf32>
    %c64 = arith.constant 64 : index
    %555 = memref.load %arg5[%c64] : memref<72xf32, #tpu.memory_space<smem>>
    %556 = vector.broadcast %555 : f32 to vector<8x256xf32>
    %557 = arith.mulf %554, %556 : vector<8x256xf32>
    %558 = arith.addf %539, %557 : vector<8x256xf32>
    %c65 = arith.constant 65 : index
    %559 = memref.load %arg5[%c65] : memref<72xf32, #tpu.memory_space<smem>>
    %560 = vector.broadcast %559 : f32 to vector<8x256xf32>
    %561 = arith.mulf %554, %560 : vector<8x256xf32>
    %562 = arith.addf %543, %561 : vector<8x256xf32>
    %c66 = arith.constant 66 : index
    %563 = memref.load %arg5[%c66] : memref<72xf32, #tpu.memory_space<smem>>
    %564 = vector.broadcast %563 : f32 to vector<8x256xf32>
    %565 = arith.mulf %554, %564 : vector<8x256xf32>
    %566 = arith.addf %547, %565 : vector<8x256xf32>
    %c67 = arith.constant 67 : index
    %567 = memref.load %arg5[%c67] : memref<72xf32, #tpu.memory_space<smem>>
    %568 = vector.broadcast %567 : f32 to vector<8x256xf32>
    %569 = arith.mulf %554, %568 : vector<8x256xf32>
    %570 = arith.addf %551, %569 : vector<8x256xf32>
    %c239_i32_131 = arith.constant 239 : i32
    %571 = tpu.dynamic_rotate %245 by %c239_i32_131 dim 1 : vector<8x256xf32>, i32 -> vector<8x256xf32>
    %cst_132 = arith.constant 0.000000e+00 : f32
    %572 = vector.broadcast %cst_132 : f32 to vector<8x256xf32>
    %573 = arith.select %39, %571, %572 : vector<8x256xi1>, vector<8x256xf32>
    %c68 = arith.constant 68 : index
    %574 = memref.load %arg5[%c68] : memref<72xf32, #tpu.memory_space<smem>>
    %575 = vector.broadcast %574 : f32 to vector<8x256xf32>
    %576 = arith.mulf %573, %575 : vector<8x256xf32>
    %577 = arith.addf %558, %576 : vector<8x256xf32>
    %c69 = arith.constant 69 : index
    %578 = memref.load %arg5[%c69] : memref<72xf32, #tpu.memory_space<smem>>
    %579 = vector.broadcast %578 : f32 to vector<8x256xf32>
    %580 = arith.mulf %573, %579 : vector<8x256xf32>
    %581 = arith.addf %562, %580 : vector<8x256xf32>
    %c70 = arith.constant 70 : index
    %582 = memref.load %arg5[%c70] : memref<72xf32, #tpu.memory_space<smem>>
    %583 = vector.broadcast %582 : f32 to vector<8x256xf32>
    %584 = arith.mulf %573, %583 : vector<8x256xf32>
    %585 = arith.addf %566, %584 : vector<8x256xf32>
    %c71 = arith.constant 71 : index
    %586 = memref.load %arg5[%c71] : memref<72xf32, #tpu.memory_space<smem>>
    %587 = vector.broadcast %586 : f32 to vector<8x256xf32>
    %588 = arith.mulf %573, %587 : vector<8x256xf32>
    %589 = arith.addf %570, %588 : vector<8x256xf32>
    %cst_133 = arith.constant 5.000000e-01 : f32
    %590 = vector.broadcast %cst_133 : f32 to vector<8x256xf32>
    %591 = arith.mulf %590, %577 : vector<8x256xf32>
    %592 = math.tanh %591 : vector<8x256xf32>
    %cst_134 = arith.constant 1.000000e+00 : f32
    %593 = vector.broadcast %cst_134 : f32 to vector<8x256xf32>
    %594 = arith.mulf %593, %592 : vector<8x256xf32>
    %595 = math.exp %594 : vector<8x256xf32>
    %596 = arith.mulf %45, %595 : vector<8x256xf32>
    %597 = arith.addf %596, %585 : vector<8x256xf32>
    %cst_135 = arith.constant 5.000000e-01 : f32
    %598 = vector.broadcast %cst_135 : f32 to vector<8x256xf32>
    %599 = arith.mulf %598, %581 : vector<8x256xf32>
    %600 = math.tanh %599 : vector<8x256xf32>
    %cst_136 = arith.constant 1.000000e+00 : f32
    %601 = vector.broadcast %cst_136 : f32 to vector<8x256xf32>
    %602 = arith.mulf %601, %600 : vector<8x256xf32>
    %603 = math.exp %602 : vector<8x256xf32>
    %604 = arith.mulf %47, %603 : vector<8x256xf32>
    %605 = arith.addf %604, %589 : vector<8x256xf32>
    %c0_137 = arith.constant 0 : index
    %c0_138 = arith.constant 0 : index
    %c0_139 = arith.constant 0 : index
    %606 = vector.load %arg7[%c0_137, %c0_138, %c0_139] : memref<4x8x256xf32, #tpu.memory_space<vmem>>, vector<1x8x256xf32>
    %607 = vector.shape_cast %606 : vector<1x8x256xf32> to vector<8x256xf32>
    %608 = vector.shape_cast %244 : vector<8x256xf32> to vector<1x8x256xf32>
    tpu.vector_store %arg7[%c0_137, %c0_138, %c0_139], %608 {strides = array<i32>} : memref<4x8x256xf32, #tpu.memory_space<vmem>>, vector<1x8x256xf32>,
    %c1_140 = arith.constant 1 : index
    %c0_141 = arith.constant 0 : index
    %c0_142 = arith.constant 0 : index
    %609 = vector.load %arg7[%c1_140, %c0_141, %c0_142] : memref<4x8x256xf32, #tpu.memory_space<vmem>>, vector<1x8x256xf32>
    %610 = vector.shape_cast %609 : vector<1x8x256xf32> to vector<8x256xf32>
    %611 = vector.shape_cast %245 : vector<8x256xf32> to vector<1x8x256xf32>
    tpu.vector_store %arg7[%c1_140, %c0_141, %c0_142], %611 {strides = array<i32>} : memref<4x8x256xf32, #tpu.memory_space<vmem>>, vector<1x8x256xf32>,
    %c2_143 = arith.constant 2 : index
    %c0_144 = arith.constant 0 : index
    %c0_145 = arith.constant 0 : index
    %612 = vector.load %arg7[%c2_143, %c0_144, %c0_145] : memref<4x8x256xf32, #tpu.memory_space<vmem>>, vector<1x8x256xf32>
    %613 = vector.shape_cast %612 : vector<1x8x256xf32> to vector<8x256xf32>
    %614 = vector.shape_cast %597 : vector<8x256xf32> to vector<1x8x256xf32>
    tpu.vector_store %arg7[%c2_143, %c0_144, %c0_145], %614 {strides = array<i32>} : memref<4x8x256xf32, #tpu.memory_space<vmem>>, vector<1x8x256xf32>,
    %c3_146 = arith.constant 3 : index
    %c0_147 = arith.constant 0 : index
    %c0_148 = arith.constant 0 : index
    %615 = vector.load %arg7[%c3_146, %c0_147, %c0_148] : memref<4x8x256xf32, #tpu.memory_space<vmem>>, vector<1x8x256xf32>
    %616 = vector.shape_cast %615 : vector<1x8x256xf32> to vector<8x256xf32>
    %617 = vector.shape_cast %605 : vector<8x256xf32> to vector<1x8x256xf32>
    tpu.vector_store %arg7[%c3_146, %c0_147, %c0_148], %617 {strides = array<i32>} : memref<4x8x256xf32, #tpu.memory_space<vmem>>, vector<1x8x256xf32>,
    return
  }
  func.func @transform_0(%arg0: i32) -> (i32, i32) {
    %c0_i32 = arith.constant 0 : i32
    %c0_i32_0 = arith.constant 0 : i32
    %c0_i32_1 = arith.constant 0 : i32
    return %c0_i32, %c0_i32_0 : i32, i32
  }
  func.func @transform_1(%arg0: i32) -> (i32, i32, i32) {
    %c0_i32 = arith.constant 0 : i32
    %c0_i32_0 = arith.constant 0 : i32
    %c0_i32_1 = arith.constant 0 : i32
    return %c0_i32, %arg0, %c0_i32_0 : i32, i32, i32
  }
  func.func @transform_2(%arg0: i32) -> i32 {
    %c0_i32 = arith.constant 0 : i32
    %c0_i32_0 = arith.constant 0 : i32
    return %c0_i32 : i32
  }
  func.func @transform_3(%arg0: i32) -> i32 {
    %c0_i32 = arith.constant 0 : i32
    %c0_i32_0 = arith.constant 0 : i32
    return %c0_i32 : i32
  }
  func.func @transform_4(%arg0: i32) -> i32 {
    %c0_i32 = arith.constant 0 : i32
    %c0_i32_0 = arith.constant 0 : i32
    return %c0_i32 : i32
  }
  func.func @transform_5(%arg0: i32) -> i32 {
    %c0_i32 = arith.constant 0 : i32
    %c0_i32_0 = arith.constant 0 : i32
    return %c0_i32 : i32
  }
  func.func @transform_6(%arg0: i32) -> (i32, i32, i32) {
    %c0_i32 = arith.constant 0 : i32
    %c0_i32_0 = arith.constant 0 : i32
    %c0_i32_1 = arith.constant 0 : i32
    return %c0_i32, %arg0, %c0_i32_0 : i32, i32, i32
  }
}

</mosaic_0001>

<bundles_post_ra>
// kernel: tpu_custom_call.1
= control target key start
LH: loop header
LB: loop body
LE: loop exit
PB: predicated region body
PF: predicated region fallthrough
CT: control target
= control target key end

     0   :  { %s2829_s0 = inlined_call_operand.hbm [shape: f32[9,256], index: 0, kind: input, shape index: {}]   ;;  %s2830_s1 = inlined_call_operand.hbm [shape: f32[4,8,256], index: 1, kind: input, shape index: {}]   ;;  %s2831_s2 = inlined_call_operand.vmem [shape: f32[36], index: 2, kind: input, shape index: {}]   ;;  %s2832_s3 = inlined_call_operand.vmem [shape: f32[2], index: 3, kind: input, shape index: {}]   ;;  %s2833_s4 = inlined_call_operand.vmem [shape: f32[72], index: 4, kind: input, shape index: {}]   ;;  %s2834_s5 = inlined_call_operand.vmem [shape: f32[4], index: 5, kind: input, shape index: {}]   ;;  %s2835_s6 = inlined_call_operand.hbm [shape: f32[4,8,256], index: 6, kind: output, shape index: {}]  }
   0x1   :  { %2872 = sst [smem:[#allocation32_spill]] %s2835_s6 }
   0x2   :  { %11 = vsyncpa [#allocation3], 0 }
   0x3   :  { %12 = vsyncpa [#allocation7], 0 }
   0x4   :  { %13 = vsyncpa [#allocation5], 0 }
   0x5   :  { %14 = vsyncpa [#allocation10], 0 }
   0x6   :  { %15 = vsyncpa [#allocation13], 0  ;;  %s57_s23 = sshll.u32 %s2832_s3, 4  ;;  %s58_s23 = int_to_ptr.vmem [resolvable:$true] %s57_s23 }
   0x7   :  { %16 = vsyncpa [#allocation4], 0  ;;  %s21_s26 = sshll.u32 %s2829_s0, 4  ;;  %s1445_s27 = smov [#allocation9]   ;;  %s22_s26 = int_to_ptr.hbm [resolvable:$true] %s21_s26 }
   0x8   :  { %60 = dma.vmem_to_smem %s58_s23, 16, %s1445_s27, [#allocation10]  }
   0x9   :  { %s1446_s28 = smov [#allocation2]   ;;  %s2850_s30 = smov 256  }
   0xa   :  { %s23_s29 = sshll.u32 %s1446_s28, 4  ;;  %s2851_s7 = smov 16   ;;  %s24_s29 = int_to_ptr.vmem [resolvable:$true] %s23_s29 }
   0xb   :  { %29 = dma.hbm_to_vmem [thread:$0]  %s22_s26, 512, %s24_s29, [#allocation3], %s2850_s30, %s2850_s30, %s2851_s7  }
   0xc   :  { %s34_s9 = sshll.u32 %s2830_s1, 4  ;;  %s1449_s10 = smov [#allocation6]   ;;  %s35_s9 = int_to_ptr.hbm [resolvable:$true] %s34_s9 }
   0xd   :  { %s36_s11 = sshll.u32 %s1449_s10, 4  ;;  %s48_s13 = sshll.u32 %s2831_s2, 4  ;;  %s37_s11 = int_to_ptr.vmem [resolvable:$true] %s36_s11  ;;  %s49_s13 = int_to_ptr.vmem [resolvable:$true] %s48_s13 }
   0xe   :  { %42 = dma.hbm_to_vmem [thread:$0]  %s35_s9, 1024, %s37_s11, [#allocation7], %s2850_s30, %s2850_s30, %s2851_s7  }
   0xf   :  { %s1450_s14 = smov [#allocation8]   ;;  %s66_s17 = sshll.u32 %s2833_s4, 4  ;;  %s67_s17 = int_to_ptr.vmem [resolvable:$true] %s66_s17 }
  0x10   :  { %51 = dma.vmem_to_smem %s49_s13, 16, %s1450_s14, [#allocation5]  }
  0x11   :  { %s75_s19 = sshll.u32 %s2834_s5, 4  ;;  %s1451_s20 = smov [#allocation11]   ;;  %s76_s19 = int_to_ptr.vmem [resolvable:$true] %s75_s19 }
  0x12   :  { %69 = dma.vmem_to_smem %s67_s17, 16, %s1451_s20, [#allocation10]  }
  0x13   :  { %s1452_s2 = smov [#allocation12]  }
  0x14   :  { %78 = dma.vmem_to_smem %s76_s19, 16, %s1452_s2, [#allocation13]  }
  0x15   :  { %1433 = dma.done.wait [#allocation3], 512  }
  0x16   :  { %1434 = vsyncadd [#allocation3], 4294966784 }
  0x17   :  { %1435 = dma.done.wait [#allocation7], 1024  }
  0x18   :  { %1436 = vsyncadd [#allocation7], 4294966272 }
  0x19   :  { %1437 = dma.done.wait [#allocation5], 16  }
  0x1a   :  { %1438 = vsyncadd [#allocation5], 4294967280 }
  0x1b   :  { %1439 = dma.done.wait [#allocation10], 32  }
  0x1c   :  { %1440 = vsyncadd [#allocation10], 4294967264 }
  0x1d   :  { %1441 = dma.done.wait [#allocation13], 16  }
  0x1e   :  { %1442 = vsyncadd [#allocation13], 4294967280 }
  0x1f   :  { %103 = sfence }
  0x20   :  { %v1521_v0 = vld [vmem:[#allocation6 + $0x30] sm:$0xff]  ;;  %v1523_v1 = vld [vmem:[#allocation6 + $0x20] sm:$0xff]  ;;  %s1453_s4 = smov 17   ;;  %v1531_v2 = vld [vmem:[#allocation6 + $0x38] sm:$0xff]  ;;  %s1454_s5 = smov 15   ;;  %v186_v11 = vlaneseq  ;;  %v1460_v13 = vmov 0  }
  0x21   :  { %205 = vrot.lane.b32.xlu1 %v1521_v0, %s1453_s4  ;;  %182 = vrot.lane.b32.xlu0 %v1523_v1, %s1453_s4  ;;  %v1533_v3 = vld [vmem:[#allocation6 + $0x28] sm:$0xff]  ;;  %s1455_s21 = smov 1   ;;  %s1456_s22 = smov 127  }
  0x22   :  { %225 = vrot.lane.b32.xlu2 %v1523_v1, %s2851_s7  ;;  %s1457_s23 = smov 113   ;;  %s1458_s24 = smov 112   ;;  %v112_v9 = vld [vmem:[#allocation2 + $0x1] ss:$8 sm:$0x3]  ;;  %v1613_v12 = vand.u32 127, %v186_v11 }
  0x23   :  { %s1459_s25 = smov 111   ;;  %s1593_s26 = sld [smem:[#allocation8 + $0x4]]  ;;  %v104_v10 = vld [vmem:[#allocation2] ss:$8 sm:$0x3]  ;;  %vm113_vm0 = vcmp.gt.f32.partialorder %v112_v9, 0.5 }
  0x24   :  { %s1595_s27 = sld [smem:[#allocation8 + $0x5]]  ;;  %vm105_vm1 = vcmp.gt.f32.partialorder %v104_v10, 0.5  ;;  %v114_v14 = vsel %vm113_vm0, 1, %v1460_v13  ;;  %v120_v21 = vld [vmem:[#allocation2 + $0x2] ss:$8 sm:$0x3] }
  0x25   :  { %s1601_s28 = sld [smem:[#allocation8 + $0x2]]  ;;  %v106_v15 = vsel %vm105_vm1, 1, %v1460_v13  ;;  %v115_v18 = vperm.slane %v114_v14, 0  ;;  %v116_v19 = vperm.slane %v114_v14, 1  ;;  %vm2838_vm2 = vcmp.lt.s32.totalorder %v1613_v12, 16 }
  0x26   :  { %s1603_s29 = sld [smem:[#allocation8 + $0x3]]  ;;  %v107_v22 = vperm.slane %v106_v15, 0  ;;  %v108_v23 = vperm.slane %v106_v15, 1  ;;  %vm2840_vm3 = vcmp.lt.s32.totalorder %v1613_v12, 17  ;;  %vm121_vm4 = vcmp.gt.f32.partialorder %v120_v21, 0.5 }
  0x27   :  { %s1605_s8 = sld [smem:[#allocation9]]  ;;  %vm1636_vm5 = vcmp.eq.s32.totalorder %v115_v18, 1  ;;  %vm1640_vm6 = vcmp.eq.s32.totalorder %v116_v19, 1  ;;  %v122_v36 = vsel %vm121_vm4, 1, %v1460_v13  ;;  %vm2837_vm11 = vcmp.lt.s32.totalorder %v1613_v12, 15 }
  0x28   :  { %s1607_s3 = sld [smem:[#allocation9 + $0x1]]  ;;  %vm1653_vm7 = vcmp.eq.s32.totalorder %v107_v22, 1  ;;  %vm1659_vm8 = vcmp.eq.s32.totalorder %v108_v23, 1  ;;  %v128_v37 = vld [vmem:[#allocation2 + $0x3] ss:$8 sm:$0x3] }
  0x29   :  { %207 = vrot.lane.b32.xlu1 %v1531_v2, %s1453_s4  ;;  %184 = vrot.lane.b32.xlu0 %v1533_v3, %s1453_s4  ;;  %s1609_s9 = sld [smem:[#allocation8]]  ;;  %v235_v24 = vstv %s1593_s26  ;;  %v136_v44 = vld [vmem:[#allocation2 + $0x5] ss:$8 sm:$0x3]  ;;  %v123_v50 = vperm.slane %v122_v36, 0  ;;  %v124_v51 = vperm.slane %v122_v36, 1 }
  0x2a   :  { %227 = vrot.lane.b32.xlu2 %v1533_v3, %s2851_s7  ;;  %s1611_s10 = sld [smem:[#allocation8 + $0x1]]  ;;  %v241_v29 = vstv %s1595_s27  ;;  %vm129_vm9 = vcmp.gt.f32.partialorder %v128_v37, 0.5  ;;  %vm137_vm10 = vcmp.gt.f32.partialorder %v136_v44, 0.5  ;;  %vm2836_vm14 = vcmp.lt.s32.totalorder %v1613_v12, 1 }
  0x2b   :  { %s1616_s11 = sld [smem:[#allocation8 + $0x6]]  ;;  %v214_v30 = vstv %s1601_s28  ;;  %v130_v62 = vsel %vm129_vm9, 1, %v1460_v13  ;;  %vm1712_vm12 = vcmp.eq.s32.totalorder %v123_v50, 1  ;;  %vm1716_vm13 = vcmp.eq.s32.totalorder %v124_v51, 1 }
  0x2c   :  { %s1619_s0 = sld [smem:[#allocation8 + $0x7]]  ;;  %v220_v31 = vstv %s1603_s29  ;;  %v131_v18 = vperm.slane %v130_v62, 0  ;;  %v132_v19 = vperm.slane %v130_v62, 1  ;;  %vm2839_vm4 = vcmp.lt.s32.totalorder %v1613_v12, 127 }
  0x2d   :  { %s1623_s12 = sld [smem:[#allocation8 + $0xa]]  ;;  %v179_v40 = vstv %s1605_s8 }
  0x2e   :  { %s1628_s13 = sld [smem:[#allocation8 + $0xb]]  ;;  %v181_v45 = vstv %s1607_s3  ;;  %vm1753_vm15 = vcmp.eq.s32.totalorder %v131_v18, 1  ;;  %vm1757_vm0 = vcmp.eq.s32.totalorder %v132_v19, 1 }
  0x2f   :  { %s1630_s14 = sld [smem:[#allocation8 + $0x8]]  ;;  %v194_v34 = vstv %s1609_s9 }
  0x30   :  { %s1634_s15 = sld [smem:[#allocation8 + $0x9]]  ;;  %v200_v41 = vstv %s1611_s10 }
  0x31   :  { %248 = vrot.lane.b32.xlu1 %v1531_v2, %s2851_s7  ;;  %246 = vrot.lane.b32.xlu0 %v1521_v0, %s2851_s7  ;;  %s1648_s16 = sld [smem:[#allocation8 + $0xc]]  ;;  %v255_v47 = vstv %s1616_s11 }
  0x32   :  { %266 = vrot.lane.b32.xlu2 %v1523_v1, %s1454_s5  ;;  %s1657_s17 = sld [smem:[#allocation8 + $0xd]]  ;;  %v261_v48 = vstv %s1619_s0 }
  0x33   :  { %s1678_s1 = sld [smem:[#allocation8 + $0x14]]  ;;  %v296_v60 = vstv %s1623_s12 }
  0x34   :  { %s1682_s18 = sld [smem:[#allocation8 + $0x15]]  ;;  %v302_v61 = vstv %s1628_s13 }
  0x35   :  { %s1701_s19 = sld [smem:[#allocation8 + $0x10]]  ;;  %v276_v15 = vstv %s1630_s14 }
  0x36   :  { %s1706_s20 = sld [smem:[#allocation8 + $0x11]] }
  0x37   :  { %s1723_s2 = sld [smem:[#allocation8 + $0xe]]  ;;  %v317_v23 = vstv %s1648_s16 }
  0x38   :  { %s1727_s26 = sld [smem:[#allocation8 + $0xf]] }
  0x39   :  { %287 = vrot.lane.b32.xlu1 %v1521_v0, %s1454_s5  ;;  %268 = vrot.lane.b32.xlu0 %v1533_v3, %s1454_s5  ;;  %s1731_s27 = sld [smem:[#allocation8 + $0x12]] }
  0x3a   :  { %289 = vrot.lane.b32.xlu2 %v1531_v2, %s1454_s5  ;;  %s1824_s28 = sld [smem:[#allocation8 + $0x13]] }
  0x3b   :  { %s1837_s29 = sld [smem:[#allocation8 + $0x16]] }
  0x3c   :  { %v355_v51 = vstv %s1706_s20  ;;  %s1845_s8 = sld [smem:[#allocation8 + $0x17]] }
  0x3d   :  { %v1784_v19 = vmul.f32 %v355_v51, %v1533_v3  ;;  %s1855_s3 = sld [smem:[#allocation8 + $0x1a]] }
  0x3e   :  { %s1877_s9 = sld [smem:[#allocation8 + $0x1b]] }
  0x3f   :  { %s1883_s10 = sld [smem:[#allocation8 + $0x18]] }
  0x40   :  { %s1889_s11 = sld [smem:[#allocation8 + $0x19]] }
  0x41   :  { %309 = vrot.lane.b32.xlu1 %v1533_v3, %s1455_s21  ;;  %307 = vrot.lane.b32.xlu0 %v1523_v1, %s1455_s21  ;;  %s1904_s0 = sld [smem:[#allocation8 + $0x1c]] }
  0x42   :  { %328 = vrot.lane.b32.xlu2 %v1521_v0, %s1455_s21  ;;  %s1917_s12 = sld [smem:[#allocation8 + $0x1d]] }
  0x43   :  { %s1942_s13 = sld [smem:[#allocation8 + $0x20]] }
  0x44   :  { %s1975_s14 = sld [smem:[#allocation8 + $0x1e]] }
  0x45   :  { %s2007_s16 = sld [smem:[#allocation8 + $0x21]] }
  0x46   :  { %s2156_s20 = sld [smem:[#allocation12]] }
  0x47   :  { %s2198_s30 = sld [smem:[#allocation11 + $0xc]] }
  0x48   :  { %s2204_s6 = sld [smem:[#allocation11 + $0xe]] }
  0x49   :  { %372 = vrot.lane.b32.xlu1 %v1523_v1, %s1456_s22  ;;  %330 = vrot.lane.b32.xlu0 %v1531_v2, %s1455_s21 }
  0x4a   :  { %374 = vrot.lane.b32.xlu2 %v1533_v3, %s1456_s22 }
  0x4d   :  { %2922 = sst [smem:[#allocation29_spill]] %s2198_s30 }
  0x4e   :  { %s2218_s30 = sld [smem:[#allocation11 + $0x16]] }
  0x51   :  { %395 = vrot.lane.b32.xlu1 %v1531_v2, %s1456_s22  ;;  %393 = vrot.lane.b32.xlu0 %v1521_v0, %s1456_s22 }
  0x52   :  { %413 = vrot.lane.b32.xlu2 %v1523_v1, %s1457_s23 }
  0x59   :  { %434 = vrot.lane.b32.xlu1 %v1521_v0, %s1457_s23  ;;  %415 = vrot.lane.b32.xlu0 %v1533_v3, %s1457_s23 }
  0x5a   :  { %436 = vrot.lane.b32.xlu2 %v1531_v2, %s1457_s23 }
  0x61   :  { %456 = vrot.lane.b32.xlu1 %v1533_v3, %s1458_s24  ;;  %454 = vrot.lane.b32.xlu0 %v1523_v1, %s1458_s24 }
  0x62   :  { %475 = vrot.lane.b32.xlu2 %v1521_v0, %s1458_s24 }
  0x69   :  { %495 = vrot.lane.b32.xlu1 %v1523_v1, %s1459_s25  ;;  %477 = vrot.lane.b32.xlu0 %v1531_v2, %s1458_s24 }
  0x6a   :  { %497 = vrot.lane.b32.xlu2 %v1533_v3, %s1459_s25 }
  0x71   :  { %518 = vrot.lane.b32.xlu1 %v1531_v2, %s1459_s25  ;;  %516 = vrot.lane.b32.xlu0 %v1521_v0, %s1459_s25 }
  0x7c   :  { %v226_v4 = vpop.permute.xlu2 %225 }
  0x84   :  { %v228_v5 = vpop.permute.xlu2 %227 }
  0x85   :  { %v230_v27 = vsel %vm2838_vm2, %v226_v4, %v228_v5  ;;  %v231_v28 = vsel %vm2838_vm2, %v228_v5, %v226_v4 }
  0x86   :  { %v232_v38 = vsel %vm1636_vm5, %v231_v28, 0.0  ;;  %v233_v39 = vsel %vm1640_vm6, %v230_v27, 0.0  ;;  %v382_v28 = vstv %s1678_s1  ;;  %s2029_s1 = sld [smem:[#allocation8 + $0x23]] }
  0x87   :  { %v1684_v52 = vmul.f32 %v235_v24, %v232_v38  ;;  %v1686_v53 = vmul.f32 %v235_v24, %v233_v39  ;;  %v1688_v54 = vmul.f32 %v241_v29, %v232_v38  ;;  %v1692_v56 = vmul.f32 %v241_v29, %v233_v39 }
  0x88   :  { %v323_v24 = vstv %s1657_s17  ;;  %v388_v29 = vstv %s1682_s18  ;;  %s2027_s17 = sld [smem:[#allocation8 + $0x22]] }
  0x89   :  { %s2150_s18 = sld [smem:[#allocation11 + $0x25]] }
  0x8c   :  { %v1597_v6 = vpop.permute.xlu2 %266 }
  0x93   :  { %v1599_v7 = vpop.permute.xlu1 %205  ;;  %v183_v8 = vpop.permute.xlu0 %182 }
  0x94   :  { %v1625_v20 = vpop.permute.xlu2 %289 }
  0x9b   :  { %v1621_v16 = vpop.permute.xlu1 %207  ;;  %v185_v17 = vpop.permute.xlu0 %184 }
  0x9c   :  { %v190_v35 = vsel %vm2840_vm3, %v185_v17, %v183_v8  ;;  %v189_v46 = vsel %vm2840_vm3, %v183_v8, %v185_v17  ;;  %v1690_v55 = vpop.permute.xlu2 %328  ;;  %v210_v57 = vsel %vm2840_vm3, %v1621_v16, %v1599_v7  ;;  %v209_v63 = vsel %vm2840_vm3, %v1599_v7, %v1621_v16 }
  0x9d   :  { %v191_v49 = vsel %vm1653_vm7, %v190_v35, 0.0  ;;  %v192_v58 = vsel %vm1659_vm8, %v189_v46, 0.0  ;;  %v1721_v8 = vsel %vm137_vm10, 1, %v1460_v13  ;;  %v211_v9 = vsel %vm1653_vm7, %v210_v57, 0.0 }
  0x9e   :  { %v195_v59 = vmul.f32 %v194_v34, %v191_v49  ;;  %v196_v10 = vmul.f32 %v194_v34, %v192_v58  ;;  %v201_v7 = vmul.f32 %v200_v41, %v191_v49  ;;  %v202_v11 = vmul.f32 %v200_v41, %v192_v58 }
  0x9f   :  { %v282_v16 = vstv %s1634_s15  ;;  %v212_v21 = vsel %vm1659_vm8, %v209_v63, 0.0  ;;  %v215_v27 = vmul.f32 %v214_v30, %v211_v9  ;;  %v139_v34 = vperm.slane %v1721_v8, 0  ;;  %s1981_s15 = sld [smem:[#allocation8 + $0x1f]] }
  0xa0   :  { %v197_v22 = vadd.f32 %v195_v59, %v179_v40  ;;  %v198_v35 = vadd.f32 %v196_v10, %v179_v40  ;;  %v203_v36 = vadd.f32 %v201_v7, %v181_v45  ;;  %v204_v37 = vadd.f32 %v202_v11, %v181_v45 }
  0xa1   :  { %v216_v39 = vmul.f32 %v214_v30, %v212_v21  ;;  %v221_v41 = vmul.f32 %v220_v31, %v211_v9  ;;  %v222_v44 = vmul.f32 %v220_v31, %v212_v21  ;;  %v140_v30 = vperm.slane %v1721_v8, 1 }
  0xa2   :  { %v217_v45 = vadd.f32 %v215_v27, %v197_v22  ;;  %v349_v31 = vstv %s1701_s19  ;;  %v337_v58 = vstv %s1723_s2  ;;  %v343_v11 = vstv %s1727_s26  ;;  %s2152_s19 = sld [smem:[#allocation11 + $0x26]] }
  0xa3   :  { %v249_v42 = vpop.permute.xlu1 %248  ;;  %v247_v43 = vpop.permute.xlu0 %246  ;;  %v218_v59 = vadd.f32 %v216_v39, %v198_v35  ;;  %v223_v62 = vadd.f32 %v221_v41, %v203_v36  ;;  %v224_v63 = vadd.f32 %v222_v44, %v204_v37  ;;  %v1779_v18 = vmul.f32 %v349_v31, %v1533_v3  ;;  %s2158_s2 = sld [smem:[#allocation12 + $0x1]] }
  0xa4   :  { %v251_v38 = vsel %vm2838_vm2, %v249_v42, %v247_v43  ;;  %v250_v46 = vsel %vm2838_vm2, %v247_v43, %v249_v42  ;;  %v1761_v50 = vpop.permute.xlu2 %374  ;;  %vm1867_vm9 = vcmp.eq.s32.totalorder %v139_v34, 1  ;;  %vm1873_vm10 = vcmp.eq.s32.totalorder %v140_v30, 1  ;;  %s2162_s26 = sld [smem:[#allocation12 + $0x3]] }
  0xa5   :  { %v252_v42 = vsel %vm1636_vm5, %v251_v38, 0.0  ;;  %v253_v9 = vsel %vm1640_vm6, %v250_v46, 0.0  ;;  %v239_v37 = vadd.f32 %v1686_v53, %v218_v59  ;;  %v244_v38 = vadd.f32 %v1688_v54, %v223_v62 }
  0xa6   :  { %v256_v21 = vmul.f32 %v255_v47, %v252_v42  ;;  %v257_v35 = vmul.f32 %v255_v47, %v253_v9  ;;  %v262_v36 = vmul.f32 %v261_v48, %v252_v42  ;;  %v245_v39 = vadd.f32 %v1692_v56, %v224_v63  ;;  %v144_v42 = vld [vmem:[#allocation2 + $0x6] ss:$8 sm:$0x3] }
  0xa7   :  { %v263_v41 = vmul.f32 %v261_v48, %v253_v9  ;;  %vm145_vm1 = vcmp.gt.f32.partialorder %v144_v42, 0.5 }
  0xab   :  { %v288_v14 = vpop.permute.xlu1 %287  ;;  %v269_v17 = vpop.permute.xlu0 %268 }
  0xac   :  { %v271_v43 = vsel %vm2837_vm11, %v1597_v6, %v269_v17  ;;  %v272_v57 = vsel %vm2837_vm11, %v269_v17, %v1597_v6  ;;  %v361_v6 = vstv %s1731_s27  ;;  %v238_v17 = vadd.f32 %v1684_v52, %v217_v45  ;;  %v1830_v63 = vpop.permute.xlu2 %413  ;;  %s2164_s27 = sld [smem:[#allocation11]] }
  0xad   :  { %v273_v22 = vsel %vm1712_vm12, %v272_v57, 0.0  ;;  %v274_v27 = vsel %vm1716_vm13, %v271_v43, 0.0  ;;  %v291_v3 = vsel %vm2837_vm11, %v288_v14, %v1625_v20  ;;  %v292_v52 = vsel %vm2837_vm11, %v1625_v20, %v288_v14 }
  0xae   :  { %v277_v47 = vmul.f32 %v276_v15, %v273_v22  ;;  %v278_v44 = vmul.f32 %v276_v15, %v274_v27  ;;  %v293_v20 = vsel %vm1712_vm12, %v292_v52, 0.0  ;;  %v294_v53 = vsel %vm1716_vm13, %v291_v3, 0.0 }
  0xaf   :  { %v283_v54 = vmul.f32 %v282_v16, %v273_v22  ;;  %v284_v48 = vmul.f32 %v282_v16, %v274_v27  ;;  %v258_v56 = vadd.f32 %v256_v21, %v238_v17  ;;  %v259_v14 = vadd.f32 %v257_v35, %v239_v37 }
  0xb0   :  { %v264_v15 = vadd.f32 %v262_v36, %v244_v38  ;;  %v1822_v43 = vmul.f32 %v349_v31, %v1523_v1  ;;  %v265_v57 = vadd.f32 %v263_v41, %v245_v39  ;;  %v297_v16 = vmul.f32 %v296_v60, %v293_v20 }
  0xb1   :  { %v298_v9 = vmul.f32 %v296_v60, %v294_v53  ;;  %v279_v31 = vadd.f32 %v277_v47, %v258_v56  ;;  %v304_v37 = vmul.f32 %v302_v61, %v294_v53  ;;  %v2891_v41 = vmov 0 }
  0xb2   :  { %v285_v21 = vadd.f32 %v283_v54, %v264_v15  ;;  %v286_v22 = vadd.f32 %v284_v48, %v265_v57  ;;  %v2892_v41 = vsel %vm1873_vm10, 4294967295, %v2891_v41  ;;  %v356_v53 = vmul.f32 %v355_v51, %v1523_v1  ;;  %v152_v48 = vld [vmem:[#allocation2 + $0x7] ss:$8 sm:$0x3] }
  0xb3   :  { %v310_v10 = vpop.permute.xlu1 %309  ;;  %v308_v7 = vpop.permute.xlu0 %307  ;;  %v367_v54 = vstv %s1824_s28  ;;  %v146_v15 = vsel %vm145_vm1, 1, %v1460_v13  ;;  %vm2845_vm1 = vcmp.lt.s32.totalorder %v1613_v12, 113  ;;  %s2166_s28 = sld [smem:[#allocation11 + $0x1]] }
  0xb4   :  { %v312_v46 = vsel %vm2836_vm14, %v308_v7, %v310_v10  ;;  %v313_v45 = vsel %vm2836_vm14, %v310_v10, %v308_v7  ;;  %v280_v10 = vadd.f32 %v278_v44, %v259_v14  ;;  %v362_v14 = vmul.f32 %v361_v6, %v1521_v0 }
  0xb5   :  { %v314_v59 = vsel %vm1753_vm15, %v313_v45, 0.0  ;;  %v315_v62 = vsel %vm1757_vm0, %v312_v46, 0.0  ;;  %v306_v46 = vadd.f32 %v304_v37, %v286_v22  ;;  %v369_v42 = vmul.f32 %v367_v54, %v1531_v2 }
  0xb6   :  { %v318_v35 = vmul.f32 %v317_v23, %v314_v59  ;;  %v319_v36 = vmul.f32 %v317_v23, %v315_v62  ;;  %v324_v38 = vmul.f32 %v323_v24, %v314_v59  ;;  %v325_v39 = vmul.f32 %v323_v24, %v315_v62 }
  0xb7   :  { %v2889_v23 = vmov 0  ;;  %v300_v47 = vadd.f32 %v298_v9, %v280_v10  ;;  %v363_v62 = vmul.f32 %v361_v6, %v1531_v2  ;;  %v408_v10 = vstv %s1845_s8  ;;  %s2170_s8 = sld [smem:[#allocation11 + $0x3]] }
  0xb8   :  { %v2890_v23 = vsel %vm1867_vm9, 4294967295, %v2889_v23  ;;  %v327_v56 = vadd.f32 %v325_v39, %v306_v46  ;;  %v148_v22 = vperm.slane %v146_v15, 1  ;;  %v429_v37 = vstv %s1889_s11  ;;  %s2178_s11 = sld [smem:[#allocation11 + $0x7]] }
  0xb9   :  { %v464_v46 = vstv %s1904_s0  ;;  %s2180_s0 = sld [smem:[#allocation11 + $0x8]] }
  0xba   :  { %vm1934_vm2 = vcmp.eq.s32.totalorder %v148_v22, 1 }
  0xbb   :  { %v373_v7 = vpop.permute.xlu1 %372  ;;  %v331_v17 = vpop.permute.xlu0 %330 }
  0xbc   :  { %v332_v27 = vsel %vm2836_vm14, %v1690_v55, %v331_v17  ;;  %v333_v60 = vsel %vm2836_vm14, %v331_v17, %v1690_v55  ;;  %v303_v55 = vmul.f32 %v302_v61, %v293_v20  ;;  %v299_v61 = vadd.f32 %v297_v16, %v279_v31  ;;  %v437_v17 = vpop.permute.xlu2 %436 }
  0xbd   :  { %v334_v3 = vsel %vm1753_vm15, %v333_v60, 0.0  ;;  %v335_v52 = vsel %vm1757_vm0, %v332_v27, 0.0  ;;  %v321_v20 = vadd.f32 %v319_v36, %v300_v47  ;;  %v402_v16 = vstv %s1837_s29  ;;  %s2168_s29 = sld [smem:[#allocation11 + $0x2]] }
  0xbe   :  { %v338_v24 = vmul.f32 %v337_v58, %v334_v3  ;;  %v339_v44 = vmul.f32 %v337_v58, %v335_v52  ;;  %v305_v34 = vadd.f32 %v303_v55, %v285_v21  ;;  %v344_v8 = vmul.f32 %v343_v11, %v334_v3 }
  0xbf   :  { %v345_v30 = vmul.f32 %v343_v11, %v335_v52  ;;  %v320_v45 = vadd.f32 %v318_v35, %v299_v61  ;;  %v368_v31 = vmul.f32 %v367_v54, %v1521_v0  ;;  %vm153_vm14 = vcmp.gt.f32.partialorder %v152_v48, 0.5 }
  0xc0   :  { %v326_v58 = vadd.f32 %v324_v38, %v305_v34  ;;  %v341_v11 = vadd.f32 %v339_v44, %v321_v20  ;;  %v147_v21 = vperm.slane %v146_v15, 0  ;;  %v377_v6 = vsel %vm2839_vm4, %v373_v7, %v1761_v50 }
  0xc1   :  { %v340_v57 = vadd.f32 %v338_v24, %v320_v45  ;;  %v347_v9 = vadd.f32 %v345_v30, %v327_v56  ;;  %v378_v27 = vsel %vm2839_vm4, %v1761_v50, %v373_v7  ;;  %v443_v0 = vstv %s1855_s3  ;;  %s2172_s3 = sld [smem:[#allocation11 + $0x4]] }
  0xc2   :  { %v346_v51 = vadd.f32 %v344_v8, %v326_v58  ;;  %v353_v60 = vadd.f32 %v1779_v18, %v341_v11  ;;  %v449_v35 = vstv %s1877_s9  ;;  %v154_v36 = vsel %vm153_vm14, 1, %v1460_v13  ;;  %v160_v8 = vld [vmem:[#allocation2 + $0x10] ss:$8 sm:$0x3]  ;;  %s2174_s9 = sld [smem:[#allocation11 + $0x5]] }
  0xc3   :  { %v396_v59 = vpop.permute.xlu1 %395  ;;  %v394_v1 = vpop.permute.xlu0 %393  ;;  %v352_v2 = vadd.f32 %v1822_v43, %v340_v57  ;;  %v359_v52 = vadd.f32 %v1784_v19, %v347_v9  ;;  %v423_v55 = vstv %s1883_s10  ;;  %v379_v50 = vsel %vm1867_vm9, %v377_v6, 0.0  ;;  %s2176_s10 = sld [smem:[#allocation11 + $0x6]] }
  0xc4   :  { %v358_v3 = vadd.f32 %v356_v53, %v346_v51  ;;  %v380_v7 = vsel %vm1873_vm10, %v378_v27, 0.0  ;;  %vm1930_vm11 = vcmp.eq.s32.totalorder %v147_v21, 1  ;;  %v2893_v43 = vmov 0 }
  0xc5   :  { %v2894_v43 = vsel %vm1930_vm11, 4294967295, %v2893_v43  ;;  %v2895_v18 = vmov 0  ;;  %v397_v19 = vsel %vm2839_vm4, %v394_v1, %v396_v59  ;;  %v398_v38 = vsel %vm2839_vm4, %v396_v59, %v394_v1  ;;  %v1973_v1 = vpop.permute.xlu2 %475 }
  0xc6   :  { %v2896_v18 = vsel %vm1934_vm2, 4294967295, %v2895_v18  ;;  %v155_v39 = vperm.slane %v154_v36, 0  ;;  %v156_v61 = vperm.slane %v154_v36, 1  ;;  %v364_v47 = vadd.f32 %v362_v14, %v352_v2 }
  0xc7   :  { %v365_v24 = vadd.f32 %v363_v62, %v353_v60  ;;  %v383_v30 = vmul.f32 %v382_v28, %v379_v50  ;;  %v384_v45 = vmul.f32 %v382_v28, %v380_v7  ;;  %v370_v20 = vadd.f32 %v368_v31, %v358_v3 }
  0xc8   :  { %v371_v53 = vadd.f32 %v369_v42, %v359_v52  ;;  %v399_v54 = vsel %vm1867_vm9, %v397_v19, 0.0  ;;  %v400_v48 = vsel %vm1873_vm10, %v398_v38, 0.0  ;;  %v470_v14 = vstv %s1917_s12  ;;  %s2182_s12 = sld [smem:[#allocation11 + $0x9]] }
  0xc9   :  { %vm1961_vm4 = vcmp.eq.s32.totalorder %v155_v39, 1  ;;  %vm1965_vm3 = vcmp.eq.s32.totalorder %v156_v61, 1  ;;  %v2899_v28 = vmov 0  ;;  %v389_v57 = vmul.f32 %v388_v29, %v379_v50 }
  0xca   :  { %v2900_v28 = vsel %vm1965_vm3, 4294967295, %v2899_v28  ;;  %v390_v11 = vmul.f32 %v388_v29, %v380_v7  ;;  %v385_v59 = vadd.f32 %v383_v30, %v364_v47  ;;  %v386_v62 = vadd.f32 %v384_v45, %v365_v24 }
  0xcb   :  { %v435_v44 = vpop.permute.xlu1 %434  ;;  %v416_v34 = vpop.permute.xlu0 %415  ;;  %2901 = vst [vmem:[#allocation21_spill] sm:$0xff] %v2900_v28  ;;  %v404_v51 = vmul.f32 %v402_v16, %v400_v48  ;;  %v391_v42 = vadd.f32 %v389_v57, %v370_v20  ;;  %v409_v29 = vmul.f32 %v408_v10, %v399_v54  ;;  %v410_v22 = vmul.f32 %v408_v10, %v400_v48 }
  0xcc   :  { %v418_v58 = vsel %vm2845_vm1, %v1830_v63, %v416_v34  ;;  %v419_v56 = vsel %vm2845_vm1, %v416_v34, %v1830_v63  ;;  %v403_v63 = vmul.f32 %v402_v16, %v399_v54  ;;  %v392_v21 = vadd.f32 %v390_v11, %v371_v53 }
  0xcd   :  { %v420_v9 = vsel %vm1930_vm11, %v418_v58, 0.0  ;;  %v421_v31 = vsel %vm1934_vm2, %v419_v56, 0.0  ;;  %v438_v6 = vsel %vm2845_vm1, %v435_v44, %v437_v17  ;;  %v439_v16 = vsel %vm2845_vm1, %v437_v17, %v435_v44 }
  0xce   :  { %v505_v27 = vstv %s1942_s13  ;;  %vm2902_vm10 = vcmp.gt.f32.partialorder %v160_v8, 0.5  ;;  %v424_v60 = vmul.f32 %v423_v55, %v420_v9  ;;  %v425_v36 = vmul.f32 %v423_v55, %v421_v31  ;;  %s2184_s13 = sld [smem:[#allocation11 + $0xa]] }
  0xcf   :  { %v162_v2 = vsel %vm2902_vm10, 1, %v1460_v13  ;;  %v430_v3 = vmul.f32 %v429_v37, %v420_v9  ;;  %v431_v52 = vmul.f32 %v429_v37, %v421_v31  ;;  %v405_v19 = vadd.f32 %v403_v63, %v385_v59  ;;  %v498_v59 = vpop.permute.xlu2 %497 }
  0xd0   :  { %v406_v10 = vadd.f32 %v404_v51, %v386_v62  ;;  %vm2903_vm14 = vcmp.lt.s32.totalorder %v1613_v12, 112  ;;  %v411_v39 = vadd.f32 %v409_v29, %v391_v42  ;;  %v412_v13 = vadd.f32 %v410_v22, %v392_v21 }
  0xd1   :  { %vm2904_vm9 = vmmov %vm2903_vm14  ;;  %v440_v55 = vsel %vm1930_vm11, %v438_v6, 0.0  ;;  %v441_v37 = vsel %vm1934_vm2, %v439_v16, 0.0  ;;  %v163_v24 = vperm.slane %v162_v2, 0  ;;  %v164_v44 = vperm.slane %v162_v2, 1 }
  0xd2   :  { %v426_v34 = vadd.f32 %v424_v60, %v405_v19  ;;  %v427_v8 = vadd.f32 %v425_v36, %v406_v10  ;;  %v432_v30 = vadd.f32 %v430_v3, %v411_v39  ;;  %v433_v45 = vadd.f32 %v431_v52, %v412_v13 }
  0xd3   :  { %v457_v50 = vpop.permute.xlu1 %456  ;;  %v455_v7 = vpop.permute.xlu0 %454  ;;  %v444_v20 = vmul.f32 %v443_v0, %v440_v55  ;;  %v445_v53 = vmul.f32 %v443_v0, %v441_v37  ;;  %v484_v54 = vstv %s1975_s14  ;;  %v490_v48 = vstv %s1981_s15  ;;  %s2186_s14 = sld [smem:[#allocation11 + $0xb]] }
  0xd4   :  { %v459_v38 = vsel %vm2903_vm14, %v455_v7, %v457_v50  ;;  %v460_v17 = vsel %vm2904_vm9, %v457_v50, %v455_v7  ;;  %v450_v58 = vmul.f32 %v449_v35, %v440_v55  ;;  %v451_v56 = vmul.f32 %v449_v35, %v441_v37  ;;  %s2188_s15 = sld [smem:[#allocation11 + $0x10]] }
  0xd5   :  { %v461_v61 = vsel %vm1961_vm4, %v459_v38, 0.0  ;;  %v462_v47 = vsel %vm1965_vm3, %v460_v17, 0.0  ;;  %vm2019_vm9 = vcmp.eq.s32.totalorder %v163_v24, 1  ;;  %v2905_v51 = vmov 0 }
  0xd6   :  { %v465_v57 = vmul.f32 %v464_v46, %v461_v61  ;;  %v466_v11 = vmul.f32 %v464_v46, %v462_v47  ;;  %v471_v62 = vmul.f32 %v470_v14, %v461_v61  ;;  %v472_v63 = vmul.f32 %v470_v14, %v462_v47 }
  0xd7   :  { %v2906_v51 = vsel %vm2019_vm9, 4294967295, %v2905_v51  ;;  %vm2023_vm10 = vcmp.eq.s32.totalorder %v164_v44, 1  ;;  %v2908_v0 = vmov 0  ;;  %v446_v9 = vadd.f32 %v444_v20, %v426_v34 }
  0xd8   :  { %2907 = vst [vmem:[#allocation22_spill] sm:$0xff] %v2906_v51  ;;  %v2909_v0 = vsel %vm2023_vm10, 4294967295, %v2908_v0  ;;  %v447_v31 = vadd.f32 %v445_v53, %v427_v8  ;;  %v452_v35 = vadd.f32 %v450_v58, %v432_v30  ;;  %v453_v42 = vadd.f32 %v451_v56, %v433_v45 }
  0xd9   :  { %2910 = vst [vmem:[#allocation23_spill] sm:$0xff] %v2909_v0  ;;  %vm2911_vm14 = vcmp.lt.s32.totalorder %v1613_v12, 111  ;;  %vm2913_vm2 = vcmp.lt.s32.totalorder %v1613_v12, 112  ;;  %v467_v16 = vadd.f32 %v465_v57, %v446_v9  ;;  %v511_v17 = vstv %s2007_s16  ;;  %v167_v9 = vld [vmem:[#allocation6] sm:$0xff]  ;;  %s2190_s16 = sld [smem:[#allocation11 + $0x11]] }
  0xda   :  { %vm2912_vm1 = vmmov %vm2911_vm14  ;;  %v468_v2 = vadd.f32 %v466_v11, %v447_v31  ;;  %v473_v3 = vadd.f32 %v471_v62, %v452_v35  ;;  %v474_v52 = vadd.f32 %v472_v63, %v453_v42  ;;  %v525_v8 = vstv %s2027_s17  ;;  %v168_v31 = vld [vmem:[#allocation6 + $0x8] sm:$0xff]  ;;  %v170_v35 = vld [vmem:[#allocation6 + $0x10] sm:$0xff]  ;;  %s2192_s17 = sld [smem:[#allocation11 + $0x12]] }
  0xdb   :  { %v496_v21 = vpop.permute.xlu1 %495  ;;  %v478_v29 = vpop.permute.xlu0 %477  ;;  %vm2914_vm11 = vmmov %vm2913_vm2  ;;  %v531_v30 = vstv %s2029_s1  ;;  %v171_v42 = vld [vmem:[#allocation6 + $0x18] sm:$0xff]  ;;  %s2196_s1 = sld [smem:[#allocation11 + $0x13]] }
  0xdc   :  { %v500_v46 = vsel %vm2911_vm14, %v496_v21, %v498_v59  ;;  %v501_v14 = vsel %vm2912_vm1, %v498_v59, %v496_v21  ;;  %v479_v22 = vsel %vm2913_vm2, %v1973_v1, %v478_v29  ;;  %v480_v6 = vsel %vm2914_vm11, %v478_v29, %v1973_v1  ;;  %vm2915_vm2 = vmmov %vm2912_vm1 }
  0xdd   :  { %v481_v60 = vsel %vm1961_vm4, %v479_v22, 0.0  ;;  %v482_v36 = vsel %vm1965_vm3, %v480_v6, 0.0  ;;  %v502_v50 = vsel %vm2019_vm9, %v500_v46, 0.0  ;;  %v503_v7 = vsel %vm2023_vm10, %v501_v14, 0.0  ;;  %vm2916_vm11 = vmmov %vm2912_vm1 }
  0xde   :  { %v485_v1 = vmul.f32 %v484_v54, %v481_v60  ;;  %v486_v19 = vmul.f32 %v484_v54, %v482_v36  ;;  %v491_v10 = vmul.f32 %v490_v48, %v481_v60  ;;  %v492_v38 = vmul.f32 %v490_v48, %v482_v36 }
  0xdf   :  { %v506_v61 = vmul.f32 %v505_v27, %v502_v50  ;;  %v507_v47 = vmul.f32 %v505_v27, %v503_v7  ;;  %v512_v24 = vmul.f32 %v511_v17, %v502_v50  ;;  %v513_v44 = vmul.f32 %v511_v17, %v503_v7  ;;  %2920 = sst [smem:[#allocation27_spill]] %s2190_s16 }
  0xe0   :  { %v487_v39 = vadd.f32 %v485_v1, %v467_v16  ;;  %v488_v13 = vadd.f32 %v486_v19, %v468_v2  ;;  %v493_v55 = vadd.f32 %v491_v10, %v473_v3  ;;  %v494_v37 = vadd.f32 %v492_v38, %v474_v52  ;;  %2921 = sst [smem:[#allocation28_spill]] %s2192_s17 }
  0xe1   :  { %s2206_s17 = sld [smem:[#allocation11 + $0xf]]  ;;  %v2865_v38 = vstv %s2150_s18  ;;  %vm2925_vm1 = vcmp.lt.s32.totalorder %v1613_v12, 17  ;;  %v2960_v51 = vstv %s2196_s1 }
  0xe2   :  { %v508_v20 = vadd.f32 %v506_v61, %v487_v39  ;;  %v509_v53 = vadd.f32 %v507_v47, %v488_v13  ;;  %v514_v58 = vadd.f32 %v512_v24, %v493_v55  ;;  %v515_v56 = vadd.f32 %v513_v44, %v494_v37  ;;  %s2209_s16 = sld [smem:[#allocation11 + $0x14]]  ;;  %vm2926_vm14 = vmmov %vm2925_vm1 }
  0xe3   :  { %v519_v34 = vpop.permute.xlu1 %518  ;;  %v517_v45 = vpop.permute.xlu0 %516  ;;  %v541_v24 = vstv %s2156_s20  ;;  %v543_v44 = vstv %s2158_s2  ;;  %s2265_s20 = sld [smem:[#allocation11 + $0x1d]] }
  0xe4   :  { %v520_v54 = vsel %vm2915_vm2, %v517_v45, %v519_v34  ;;  %v521_v48 = vsel %vm2916_vm11, %v519_v34, %v517_v45  ;;  %vm2932_vm2 = vmmov %vm2925_vm1  ;;  %s2337_s2 = sld [smem:[#allocation11 + $0x1a]] }
  0xe5   :  { %v522_v57 = vsel %vm2019_vm9, %v520_v54, 0.0  ;;  %v523_v27 = vsel %vm2023_vm10, %v521_v48, 0.0  ;;  %v563_v54 = vstv %s2166_s28  ;;  %v569_v48 = vstv %s2168_s29  ;;  %s2929_s28 = sld [smem:[#allocation29_spill]]  ;;  %vm2933_vm11 = vmmov %vm2925_vm1 }
  0xe6   :  { %v526_v11 = vmul.f32 %v525_v8, %v522_v57  ;;  %v527_v59 = vmul.f32 %v525_v8, %v523_v27  ;;  %v532_v62 = vmul.f32 %v531_v30, %v522_v57  ;;  %v533_v63 = vmul.f32 %v531_v30, %v523_v27  ;;  %s2654_s1 = sld [smem:[#allocation11 + $0x40]] }
  0xe8   :  { %v528_v21 = vadd.f32 %v526_v11, %v508_v20  ;;  %v529_v29 = vadd.f32 %v527_v59, %v509_v53  ;;  %v534_v46 = vadd.f32 %v532_v62, %v514_v58  ;;  %v535_v14 = vadd.f32 %v533_v63, %v515_v56  ;;  %2924 = sst [smem:[#allocation31_spill]] %s2209_s16 }
  0xe9   :  { %s2227_s16 = sld [smem:[#allocation11 + $0x17]]  ;;  %v547_v20 = vstv %s2162_s26  ;;  %v557_v53 = vstv %s2164_s27  ;;  %v575_v58 = vstv %s2170_s8  ;;  %v589_v59 = vstv %s2172_s3 }
  0xea   :  { %v2064_v22 = vadd.f32 %v528_v21, %v167_v9  ;;  %v2066_v6 = vadd.f32 %v529_v29, %v168_v31  ;;  %v2068_v16 = vadd.f32 %v534_v46, %v170_v35  ;;  %v2070_v2 = vadd.f32 %v535_v14, %v171_v42  ;;  %s2273_s27 = sld [smem:[#allocation11 + $0x1e]] }
  0xeb   :  { %v595_v62 = vstv %s2174_s9  ;;  %v601_v63 = vstv %s2176_s10  ;;  %v607_v9 = vstv %s2178_s11  ;;  %s2931_s29 = sld [smem:[#allocation31_spill]]  ;;  %v621_v31 = vstv %s2180_s0 }
  0xec   :  { %1132 = vst [vmem:[#allocation14] sm:$0xff] %v2064_v22  ;;  %550 = vrot.lane.b32.xlu0 %v2066_v6, %s1453_s4  ;;  %580 = vrot.lane.b32.xlu1 %v2068_v16, %s1453_s4  ;;  %v2257_v8 = vmul.f32 %v2865_v38, %v2068_v16  ;;  %s2279_s8 = sld [smem:[#allocation11 + $0x1f]]  ;;  %v627_v35 = vstv %s2182_s12 }
  0xed   :  { %1133 = vst [vmem:[#allocation14 + $0x8] sm:$0xff] %v2066_v6  ;;  %548 = vrot.lane.b32.xlu2 %v2064_v22, %s1453_s4  ;;  %s2317_s3 = sld [smem:[#allocation11 + $0x18]] }
  0xee   :  { %1135 = vst [vmem:[#allocation14 + $0x10] sm:$0xff] %v2068_v16  ;;  %s2327_s9 = sld [smem:[#allocation11 + $0x19]] }
  0xef   :  { %1136 = vst [vmem:[#allocation14 + $0x18] sm:$0xff] %v2070_v2  ;;  %s2339_s10 = sld [smem:[#allocation11 + $0x1b]] }
  0xf0   :  { %s2512_s26 = sld [smem:[#allocation11 + $0x30]] }
  0xf1   :  { %s2517_s11 = sld [smem:[#allocation11 + $0x31]] }
  0xf2   :  { %s2577_s0 = sld [smem:[#allocation11 + $0x2e]] }
  0xf3   :  { %s2589_s12 = sld [smem:[#allocation11 + $0x34]] }
  0xf4   :  { %614 = vrot.lane.b32.xlu1 %v2066_v6, %s2851_s7  ;;  %612 = vrot.lane.b32.xlu0 %v2064_v22, %s2851_s7 }
  0xf5   :  { %582 = vrot.lane.b32.xlu2 %v2070_v2, %s1453_s4  ;;  %s2140_s4 = sld [smem:[#allocation11 + $0x20]] }
  0xfb   :  { %v2864_v50 = vstv %s2140_s4 }
  0xfc   :  { %676 = vrot.lane.b32.xlu1 %v2064_v22, %s1454_s5  ;;  %646 = vrot.lane.b32.xlu0 %v2070_v2, %s2851_s7  ;;  %v2223_v17 = vmul.f32 %v2864_v50, %v2066_v6 }
  0xfd   :  { %644 = vrot.lane.b32.xlu2 %v2068_v16, %s2851_s7  ;;  %s2200_s7 = sld [smem:[#allocation11 + $0xd]] }
 0x103   :  { %2923 = sst [smem:[#allocation30_spill]] %s2200_s7 }
 0x104   :  { %710 = vrot.lane.b32.xlu1 %v2070_v2, %s1454_s5  ;;  %708 = vrot.lane.b32.xlu0 %v2068_v16, %s1454_s5  ;;  %s2215_s7 = sld [smem:[#allocation11 + $0x15]] }
 0x105   :  { %678 = vrot.lane.b32.xlu2 %v2066_v6, %s1454_s5  ;;  %s2142_s5 = sld [smem:[#allocation11 + $0x21]] }
 0x10b   :  { %v2863_v7 = vstv %s2142_s5 }
 0x10c   :  { %772 = vrot.lane.b32.xlu1 %v2068_v16, %s1455_s21  ;;  %742 = vrot.lane.b32.xlu0 %v2066_v6, %s1455_s21  ;;  %v2232_v55 = vmul.f32 %v2863_v7, %v2066_v6 }
 0x10d   :  { %740 = vrot.lane.b32.xlu2 %v2064_v22, %s1455_s21 }
 0x114   :  { %854 = vrot.lane.b32.xlu1 %v2066_v6, %s1456_s22  ;;  %852 = vrot.lane.b32.xlu0 %v2064_v22, %s1456_s22 }
 0x115   :  { %774 = vrot.lane.b32.xlu2 %v2070_v2, %s1455_s21  ;;  %s2144_s21 = sld [smem:[#allocation11 + $0x22]] }
 0x11b   :  { %2917 = sst [smem:[#allocation24_spill]] %s2144_s21  ;;  %v2862_v1 = vstv %s2144_s21 }
 0x11c   :  { %916 = vrot.lane.b32.xlu1 %v2064_v22, %s1457_s23  ;;  %886 = vrot.lane.b32.xlu0 %v2070_v2, %s1456_s22  ;;  %v2237_v37 = vmul.f32 %v2862_v1, %v2066_v6  ;;  %s2930_s21 = sld [smem:[#allocation30_spill]] }
 0x11d   :  { %884 = vrot.lane.b32.xlu2 %v2068_v16, %s1456_s22  ;;  %s2146_s22 = sld [smem:[#allocation11 + $0x23]] }
 0x123   :  { %2918 = sst [smem:[#allocation25_spill]] %s2146_s22  ;;  %v2861_v19 = vstv %s2146_s22 }
 0x124   :  { %950 = vrot.lane.b32.xlu1 %v2070_v2, %s1457_s23  ;;  %948 = vrot.lane.b32.xlu0 %v2068_v16, %s1457_s23  ;;  %v2242_v61 = vmul.f32 %v2861_v19, %v2066_v6  ;;  %s2927_s22 = sld [smem:[#allocation27_spill]] }
 0x125   :  { %918 = vrot.lane.b32.xlu2 %v2066_v6, %s1457_s23  ;;  %s2148_s23 = sld [smem:[#allocation11 + $0x24]] }
 0x12a   :  { %v2954_v1 = vstv %s2927_s22  ;;  %s2507_s22 = sld [smem:[#allocation11 + $0x2b]] }
 0x12b   :  { %v829_v10 = vstv %s2148_s23  ;;  %s2249_s23 = sld [smem:[#allocation11 + $0x1c]] }
 0x12c   :  { %1012 = vrot.lane.b32.xlu1 %v2068_v16, %s1458_s24  ;;  %982 = vrot.lane.b32.xlu0 %v2066_v6, %s1458_s24  ;;  %v2245_v47 = vmul.f32 %v829_v10, %v2068_v16  ;;  %v2252_v34 = vmul.f32 %v829_v10, %v2070_v2 }
 0x12d   :  { %980 = vrot.lane.b32.xlu2 %v2064_v22, %s1458_s24 }
 0x134   :  { %1046 = vrot.lane.b32.xlu1 %v2066_v6, %s1459_s25  ;;  %1044 = vrot.lane.b32.xlu0 %v2064_v22, %s1459_s25 }
 0x135   :  { %1014 = vrot.lane.b32.xlu2 %v2070_v2, %s1458_s24  ;;  %s2154_s24 = sld [smem:[#allocation11 + $0x27]] }
 0x13b   :  { %2919 = sst [smem:[#allocation26_spill]] %s2154_s24 }
 0x13c   :  { %1078 = vrot.lane.b32.xlu0 %v2070_v2, %s1459_s25  ;;  %s2928_s24 = sld [smem:[#allocation28_spill]] }
 0x13d   :  { %1076 = vrot.lane.b32.xlu2 %v2068_v16, %s1459_s25  ;;  %s2160_s25 = sld [smem:[#allocation12 + $0x2]] }
 0x143   :  { %v545_v45 = vstv %s2160_s25  ;;  %s2993_s25 = sld [smem:[#allocation25_spill]] }
 0x147   :  { %v549_v60 = vpop.permute.xlu2 %548 }
 0x14f   :  { %v2194_v36 = vpop.permute.xlu2 %582 }
 0x157   :  { %v2259_v30 = vpop.permute.xlu2 %644 }
 0x15e   :  { %v551_v3 = vpop.permute.xlu0 %550  ;;  %v2202_v52 = vpop.permute.xlu1 %580 }
 0x15f   :  { %v552_v56 = vsel %vm2925_vm1, %v549_v60, %v551_v3  ;;  %v553_v57 = vsel %vm2926_vm14, %v551_v3, %v549_v60  ;;  %v584_v3 = vsel %vm2932_vm2, %v2202_v52, %v2194_v36  ;;  %v585_v7 = vsel %vm2933_vm11, %v2194_v36, %v2202_v52 }
 0x160   :  { %v554_v29 = vsel %vm1653_vm7, %v553_v57, 0.0  ;;  %v555_v46 = vsel %vm1659_vm8, %v552_v56, 0.0  ;;  %v586_v36 = vsel %vm1653_vm7, %v585_v7, 0.0  ;;  %v587_v52 = vsel %vm1659_vm8, %v584_v3, 0.0 }
 0x161   :  { %v558_v50 = vmul.f32 %v557_v53, %v554_v29  ;;  %v559_v38 = vmul.f32 %v557_v53, %v555_v46  ;;  %v564_v42 = vmul.f32 %v563_v54, %v554_v29  ;;  %v565_v56 = vmul.f32 %v563_v54, %v555_v46 }
 0x162   :  { %v570_v39 = vmul.f32 %v569_v48, %v554_v29  ;;  %v571_v60 = vmul.f32 %v569_v48, %v555_v46  ;;  %v576_v53 = vmul.f32 %v575_v58, %v554_v29  ;;  %v577_v6 = vmul.f32 %v575_v58, %v555_v46  ;;  %v679_v48 = vpop.permute.xlu2 %678 }
 0x163   :  { %v560_v19 = vadd.f32 %v558_v50, %v541_v24  ;;  %v561_v10 = vadd.f32 %v559_v38, %v541_v24  ;;  %v566_v58 = vadd.f32 %v564_v42, %v543_v44  ;;  %v567_v29 = vadd.f32 %v565_v56, %v543_v44 }
 0x164   :  { %vm2934_vm1 = vcmp.lt.s32.totalorder %v1613_v12, 16  ;;  %v572_v32 = vadd.f32 %v570_v39, %v545_v45  ;;  %v573_v33 = vadd.f32 %v571_v60, %v545_v45  ;;  %v578_v7 = vadd.f32 %v576_v53, %v547_v20 }
 0x165   :  { %vm2935_vm14 = vmmov %vm2934_vm1  ;;  %v579_v38 = vadd.f32 %v577_v6, %v547_v20  ;;  %v590_v24 = vmul.f32 %v589_v59, %v586_v36  ;;  %v591_v44 = vmul.f32 %v589_v59, %v587_v52  ;;  %v596_v42 = vmul.f32 %v595_v62, %v586_v36 }
 0x166   :  { %v615_v27 = vpop.permute.xlu1 %614  ;;  %v613_v11 = vpop.permute.xlu0 %612  ;;  %v597_v3 = vmul.f32 %v595_v62, %v587_v52  ;;  %v608_v59 = vmul.f32 %v607_v9, %v586_v36  ;;  %v609_v62 = vmul.f32 %v607_v9, %v587_v52  ;;  %vm2936_vm7 = vmmov %vm2934_vm1  ;;  %vm2941_vm2 = vcmp.lt.s32.totalorder %v1613_v12, 15 }
 0x167   :  { %v616_v46 = vsel %vm2934_vm1, %v613_v11, %v615_v27  ;;  %v617_v50 = vsel %vm2935_vm14, %v615_v27, %v613_v11  ;;  %v602_v27 = vmul.f32 %v601_v63, %v586_v36  ;;  %v603_v11 = vmul.f32 %v601_v63, %v587_v52  ;;  %vm2937_vm8 = vmmov %vm2934_vm1 }
 0x168   :  { %v618_v39 = vsel %vm1636_vm5, %v617_v50, 0.0  ;;  %v619_v45 = vsel %vm1640_vm6, %v616_v46, 0.0  ;;  %v592_v20 = vadd.f32 %v590_v24, %v560_v19  ;;  %v593_v6 = vadd.f32 %v591_v44, %v561_v10  ;;  %vm2942_vm11 = vmmov %vm2941_vm2 }
 0x169   :  { %v598_v60 = vadd.f32 %v596_v42, %v566_v58  ;;  %v599_v63 = vadd.f32 %v597_v3, %v567_v29  ;;  %v604_v56 = vadd.f32 %v602_v27, %v572_v32  ;;  %v605_v53 = vadd.f32 %v603_v11, %v573_v33 }
 0x16a   :  { %v610_v14 = vadd.f32 %v608_v59, %v578_v7  ;;  %v611_v46 = vadd.f32 %v609_v62, %v579_v38  ;;  %v622_v19 = vmul.f32 %v621_v31, %v618_v39  ;;  %v623_v10 = vmul.f32 %v621_v31, %v619_v45  ;;  %v741_v42 = vpop.permute.xlu2 %740 }
 0x16b   :  { %v628_v9 = vmul.f32 %v627_v35, %v618_v39  ;;  %v629_v36 = vmul.f32 %v627_v35, %v619_v45  ;;  %v2938_v29 = vstv %s2184_s13  ;;  %v2940_v31 = vstv %s2186_s14  ;;  %s2593_s13 = sld [smem:[#allocation11 + $0x35]] }
 0x16c   :  { %v634_v32 = vmul.f32 %v2938_v29, %v618_v39  ;;  %v2939_v33 = vmov %v2938_v29  ;;  %v640_v44 = vmul.f32 %v2940_v31, %v618_v39  ;;  %v2943_v11 = vmov %v2940_v31  ;;  %s2615_s14 = sld [smem:[#allocation11 + $0x38]] }
 0x16d   :  { %v635_v7 = vmul.f32 %v2939_v33, %v619_v45  ;;  %v624_v62 = vadd.f32 %v622_v19, %v592_v20  ;;  %v625_v29 = vadd.f32 %v623_v10, %v593_v6  ;;  %v630_v33 = vadd.f32 %v628_v9, %v598_v60 }
 0x16e   :  { %v677_v57 = vpop.permute.xlu1 %676  ;;  %v647_v21 = vpop.permute.xlu0 %646  ;;  %v2944_v20 = vstv %s2929_s28  ;;  %v2946_v10 = vstv %s2930_s21  ;;  %vm2962_vm1 = vcmp.lt.s32.totalorder %v1613_v12, 1  ;;  %s2990_s21 = sld [smem:[#allocation24_spill]] }
 0x16f   :  { %v648_v52 = vsel %vm2936_vm7, %v2259_v30, %v647_v21  ;;  %v649_v58 = vsel %vm2937_vm8, %v647_v21, %v2259_v30  ;;  %v680_v35 = vsel %vm2941_vm2, %v677_v57, %v679_v48  ;;  %v681_v3 = vsel %vm2942_vm11, %v679_v48, %v677_v57  ;;  %vm2963_vm14 = vmmov %vm2962_vm1  ;;  %s2696_s28 = sld [smem:[#allocation11 + $0x45]] }
 0x170   :  { %v641_v30 = vmul.f32 %v2943_v11, %v619_v45  ;;  %v650_v21 = vsel %vm1636_vm5, %v649_v58, 0.0  ;;  %v651_v59 = vsel %vm1640_vm6, %v648_v52, 0.0  ;;  %v631_v57 = vadd.f32 %v629_v36, %v599_v63  ;;  %vm2953_vm5 = vmmov %vm2941_vm2 }
 0x171   :  { %v636_v48 = vadd.f32 %v634_v32, %v604_v56  ;;  %v637_v31 = vadd.f32 %v635_v7, %v605_v53  ;;  %v682_v25 = vsel %vm1712_vm12, %v681_v3, 0.0  ;;  %v683_v26 = vsel %vm1716_vm13, %v680_v35, 0.0  ;;  %vm2957_vm6 = vmmov %vm2941_vm2 }
 0x172   :  { %v642_v45 = vadd.f32 %v640_v44, %v610_v14  ;;  %v654_v6 = vmul.f32 %v2944_v20, %v650_v21  ;;  %v2945_v19 = vmov %v2944_v20  ;;  %v660_v63 = vmul.f32 %v2946_v10, %v650_v21 }
 0x173   :  { %v655_v60 = vmul.f32 %v2945_v19, %v651_v59  ;;  %v643_v53 = vadd.f32 %v641_v30, %v611_v46  ;;  %v2947_v36 = vmov %v2946_v10  ;;  %v2948_v58 = vstv %s2204_s6  ;;  %s2485_s6 = sld [smem:[#allocation11 + $0x28]] }
 0x174   :  { %v661_v52 = vmul.f32 %v2947_v36, %v651_v59  ;;  %v666_v32 = vmul.f32 %v2948_v58, %v650_v21  ;;  %v2949_v7 = vmov %v2948_v58  ;;  %v2950_v35 = vstv %s2188_s15  ;;  %s2626_s15 = sld [smem:[#allocation11 + $0x39]] }
 0x175   :  { %v667_v3 = vmul.f32 %v2949_v7, %v651_v59  ;;  %v686_v11 = vmul.f32 %v2950_v35, %v682_v25  ;;  %v2951_v14 = vmov %v2950_v35  ;;  %v2952_v20 = vstv %s2206_s17  ;;  %s2646_s17 = sld [smem:[#allocation11 + $0x3d]] }
 0x176   :  { %v711_v50 = vpop.permute.xlu1 %710  ;;  %v709_v13 = vpop.permute.xlu0 %708  ;;  %v687_v44 = vmul.f32 %v2951_v14, %v683_v26  ;;  %v672_v19 = vmul.f32 %v2952_v20, %v650_v21  ;;  %v692_v54 = vmul.f32 %v2954_v1, %v682_v25  ;;  %v2955_v46 = vmov %v2954_v1 }
 0x177   :  { %v713_v10 = vsel %vm2953_vm5, %v711_v50, %v709_v13  ;;  %v693_v30 = vmul.f32 %v2955_v46, %v683_v26  ;;  %v2956_v36 = vmov %v2952_v20  ;;  %v712_v7 = vsel %vm2957_vm6, %v709_v13, %v711_v50 }
 0x178   :  { %v673_v58 = vmul.f32 %v2956_v36, %v651_v59  ;;  %v2958_v35 = vstv %s2928_s24  ;;  %v656_v27 = vadd.f32 %v654_v6, %v624_v62  ;;  %v657_v14 = vadd.f32 %v655_v60, %v625_v29  ;;  %v775_v36 = vpop.permute.xlu2 %774  ;;  %s2991_s24 = sld [smem:[#allocation26_spill]] }
 0x179   :  { %v698_v39 = vmul.f32 %v2958_v35, %v682_v25  ;;  %v662_v24 = vadd.f32 %v660_v63, %v630_v33  ;;  %v663_v38 = vadd.f32 %v661_v52, %v631_v57  ;;  %v668_v21 = vadd.f32 %v666_v32, %v636_v48 }
 0x17a   :  { %v669_v20 = vadd.f32 %v667_v3, %v637_v31  ;;  %v714_v1 = vsel %vm1712_vm12, %v713_v10, 0.0  ;;  %v2959_v0 = vmov %v2958_v35  ;;  %v704_v28 = vmul.f32 %v2960_v51, %v682_v25  ;;  %vm2972_vm12 = vmmov %vm2962_vm1 }
 0x17b   :  { %v699_v46 = vmul.f32 %v2959_v0, %v683_v26  ;;  %v674_v59 = vadd.f32 %v672_v19, %v642_v45  ;;  %v715_v13 = vsel %vm1716_vm13, %v712_v7, 0.0  ;;  %v2961_v50 = vmov %v2960_v51  ;;  %vm2973_vm13 = vmmov %vm2962_vm1 }
 0x17c   :  { %v705_v62 = vmul.f32 %v2961_v50, %v683_v26  ;;  %v675_v29 = vadd.f32 %v673_v58, %v643_v53  ;;  %v688_v0 = vadd.f32 %v686_v11, %v656_v27  ;;  %v689_v51 = vadd.f32 %v687_v44, %v657_v14 }
 0x17d   :  { %v694_v57 = vadd.f32 %v692_v54, %v662_v24  ;;  %v2964_v48 = vstv %s2931_s29  ;;  %v695_v26 = vadd.f32 %v693_v30, %v663_v38  ;;  %v700_v45 = vadd.f32 %v698_v39, %v668_v21  ;;  %s2724_s29 = sld [smem:[#allocation11 + $0x36]] }
 0x17e   :  { %v773_v56 = vpop.permute.xlu1 %772  ;;  %v743_v9 = vpop.permute.xlu0 %742  ;;  %v718_v31 = vmul.f32 %v2964_v48, %v714_v1  ;;  %v701_v6 = vadd.f32 %v699_v46, %v669_v20  ;;  %v2965_v60 = vmov %v2964_v48  ;;  %v706_v27 = vadd.f32 %v704_v28, %v674_v59 }
 0x17f   :  { %v744_v33 = vsel %vm2962_vm1, %v741_v42, %v743_v9  ;;  %v745_v4 = vsel %vm2963_vm14, %v743_v9, %v741_v42  ;;  %v719_v42 = vmul.f32 %v2965_v60, %v715_v13  ;;  %v2966_v63 = vstv %s2215_s7  ;;  %s2501_s7 = sld [smem:[#allocation11 + $0x2a]] }
 0x180   :  { %v724_v9 = vmul.f32 %v2966_v63, %v714_v1  ;;  %v746_v54 = vsel %vm1753_vm15, %v745_v4, 0.0  ;;  %v747_v24 = vsel %vm1757_vm0, %v744_v33, 0.0  ;;  %v707_v53 = vadd.f32 %v705_v62, %v675_v29 }
 0x181   :  { %v2967_v38 = vmov %v2966_v63  ;;  %v2968_v52 = vstv %s2218_s30  ;;  %v720_v11 = vadd.f32 %v718_v31, %v688_v0  ;;  %v2970_v44 = vstv %s2227_s16  ;;  %v2477_v63 = vpop.permute.xlu2 %884  ;;  %s2491_s30 = sld [smem:[#allocation11 + $0x29]] }
 0x182   :  { %v725_v39 = vmul.f32 %v2967_v38, %v715_v13  ;;  %v730_v32 = vmul.f32 %v2968_v52, %v714_v1  ;;  %v2969_v3 = vmov %v2968_v52  ;;  %v736_v19 = vmul.f32 %v2970_v44, %v714_v1  ;;  %s2639_s16 = sld [smem:[#allocation11 + $0x3c]] }
 0x183   :  { %v731_v28 = vmul.f32 %v2969_v3, %v715_v13  ;;  %v2971_v10 = vmov %v2970_v44  ;;  %v777_v58 = vsel %vm2972_vm12, %v775_v36, %v773_v56  ;;  %v721_v7 = vadd.f32 %v719_v42, %v689_v51 }
 0x184   :  { %v737_v30 = vmul.f32 %v2971_v10, %v715_v13  ;;  %v776_v35 = vsel %vm2973_vm13, %v773_v56, %v775_v36  ;;  %v2974_v14 = vstv %s2317_s3  ;;  %v726_v59 = vadd.f32 %v724_v9, %v694_v57  ;;  %s2742_s3 = sld [smem:[#allocation11 + $0x3a]] }
 0x185   :  { %v750_v21 = vmul.f32 %v2974_v14, %v746_v54  ;;  %v2975_v20 = vmov %v2974_v14  ;;  %v2976_v50 = vstv %s2327_s9  ;;  %v2978_v4 = vstv %s2337_s2  ;;  %s2752_s9 = sld [smem:[#allocation11 + $0x3e]] }
 0x186   :  { %v2433_v5 = vpop.permute.xlu1 %854  ;;  %v2435_v25 = vpop.permute.xlu0 %852  ;;  %v751_v46 = vmul.f32 %v2975_v20, %v747_v24  ;;  %v756_v62 = vmul.f32 %v2976_v50, %v746_v54  ;;  %v2977_v29 = vmov %v2976_v50  ;;  %v762_v1 = vmul.f32 %v2978_v4, %v746_v54  ;;  %s2765_s2 = sld [smem:[#allocation11 + $0x3b]] }
 0x187   :  { %v757_v33 = vmul.f32 %v2977_v29, %v747_v24  ;;  %v778_v13 = vsel %vm1753_vm15, %v777_v58, 0.0  ;;  %v2979_v0 = vmov %v2978_v4  ;;  %v2980_v48 = vstv %s2339_s10  ;;  %s2776_s10 = sld [smem:[#allocation11 + $0x3f]] }
 0x188   :  { %v763_v51 = vmul.f32 %v2979_v0, %v747_v24  ;;  %v768_v31 = vmul.f32 %v2980_v48, %v746_v54  ;;  %v2981_v56 = vmov %v2980_v48  ;;  %v727_v60 = vadd.f32 %v725_v39, %v695_v26 }
 0x189   :  { %v769_v36 = vmul.f32 %v2981_v56, %v747_v24  ;;  %v732_v42 = vadd.f32 %v730_v32, %v700_v45  ;;  %v733_v57 = vadd.f32 %v731_v28, %v701_v6  ;;  %v779_v9 = vsel %vm1757_vm0, %v776_v35, 0.0 }
 0x18a   :  { %v738_v49 = vadd.f32 %v736_v19, %v706_v27  ;;  %v739_v52 = vadd.f32 %v737_v30, %v707_v53  ;;  %v752_v3 = vadd.f32 %v750_v21, %v720_v11  ;;  %v753_v54 = vadd.f32 %v751_v46, %v721_v7 }
 0x18b   :  { %v2982_v24 = vstv %s2249_s23  ;;  %v758_v45 = vadd.f32 %v756_v62, %v726_v59  ;;  %v759_v6 = vadd.f32 %v757_v33, %v727_v60  ;;  %v764_v39 = vadd.f32 %v762_v1, %v732_v42  ;;  %s2660_s23 = sld [smem:[#allocation11 + $0x41]] }
 0x18c   :  { %v782_v26 = vmul.f32 %v2982_v24, %v778_v13  ;;  %v2983_v32 = vmov %v2982_v24  ;;  %v765_v27 = vadd.f32 %v763_v51, %v733_v57  ;;  %v770_v44 = vadd.f32 %v768_v31, %v738_v49 }
 0x18d   :  { %v783_v28 = vmul.f32 %v2983_v32, %v779_v9  ;;  %v771_v53 = vadd.f32 %v769_v36, %v739_v52  ;;  %v2984_v11 = vstv %s2265_s20  ;;  %v2986_v58 = vstv %s2273_s27  ;;  %s2682_s20 = sld [smem:[#allocation11 + $0x2f]] }
 0x18e   :  { %v2481_v38 = vpop.permute.xlu0 %886  ;;  %v2487_v40 = vpop.permute.xlu1 %916  ;;  %v788_v19 = vmul.f32 %v2984_v11, %v778_v13  ;;  %v2985_v10 = vmov %v2984_v11  ;;  %v794_v7 = vmul.f32 %v2986_v58, %v778_v13  ;;  %v2987_v35 = vmov %v2986_v58  ;;  %s2690_s27 = sld [smem:[#allocation11 + $0x44]] }
 0x18f   :  { %v789_v30 = vmul.f32 %v2985_v10, %v779_v9  ;;  %v795_v14 = vmul.f32 %v2987_v35, %v779_v9  ;;  %v2988_v21 = vstv %s2279_s8  ;;  %v784_v50 = vadd.f32 %v782_v26, %v752_v3  ;;  %s2734_s8 = sld [smem:[#allocation11 + $0x37]] }
 0x190   :  { %v800_v20 = vmul.f32 %v2988_v21, %v778_v13  ;;  %v2989_v46 = vmov %v2988_v21  ;;  %v785_v62 = vadd.f32 %v783_v28, %v753_v54  ;;  %v790_v29 = vadd.f32 %v788_v19, %v758_v45  ;;  %v919_v28 = vpop.permute.xlu2 %918 }
 0x191   :  { %v801_v59 = vmul.f32 %v2989_v46, %v779_v9  ;;  %v791_v33 = vadd.f32 %v789_v30, %v759_v6  ;;  %v796_v4 = vadd.f32 %v794_v7, %v764_v39  ;;  %v2992_v1 = vstv %s2150_s18  ;;  %s2531_s18 = sld [smem:[#allocation11 + $0x32]] }
 0x192   :  { %v837_v0 = vmul.f32 %v2992_v1, %v2070_v2  ;;  %v797_v13 = vadd.f32 %v795_v14, %v765_v27  ;;  %v802_v51 = vadd.f32 %v800_v20, %v770_v44  ;;  %v2994_v31 = vstv %s2140_s4  ;;  %s2542_s4 = sld [smem:[#allocation11 + $0x33]] }
 0x193   :  { %v803_v48 = vadd.f32 %v801_v59, %v771_v53  ;;  %v806_v56 = vmul.f32 %v2994_v31, %v2064_v22  ;;  %v2995_v36 = vstv %s2152_s19  ;;  %v2997_v9 = vstv %s2142_s5  ;;  %s2549_s5 = sld [smem:[#allocation11 + $0x2c]] }
 0x194   :  { %v842_v60 = vmul.f32 %v2995_v36, %v2068_v16  ;;  %v2996_v42 = vmov %v2995_v36  ;;  %v812_v49 = vmul.f32 %v2997_v9, %v2064_v22  ;;  %v2998_v52 = vstv %s2990_s21  ;;  %s2557_s19 = sld [smem:[#allocation11 + $0x2d]] }
 0x195   :  { %v843_v57 = vmul.f32 %v2996_v42, %v2070_v2  ;;  %v818_v3 = vmul.f32 %v2998_v52, %v2064_v22  ;;  %v2999_v24 = vstv %s2991_s24  ;;  %v808_v45 = vadd.f32 %v806_v56, %v784_v50  ;;  %s2800_s21 = sld [smem:[#allocation11 + $0x47]] }
 0x196   :  { %v2533_v54 = vpop.permute.xlu0 %948  ;;  %v848_v26 = vmul.f32 %v2999_v24, %v2068_v16  ;;  %v809_v6 = vadd.f32 %v2223_v17, %v785_v62  ;;  %v3000_v39 = vstv %s2993_s25  ;;  %v814_v27 = vadd.f32 %v812_v49, %v790_v29  ;;  %v951_v35 = vpop.permute.xlu1 %950 }
 0x197   :  { %v824_v32 = vmul.f32 %v3000_v39, %v2064_v22  ;;  %v815_v44 = vadd.f32 %v2232_v55, %v791_v33  ;;  %v820_v53 = vadd.f32 %v818_v3, %v796_v4  ;;  %vm3001_vm15 = vcmp.lt.s32.totalorder %v1613_v12, 127 }
 0x198   :  { %v856_v16 = vsel %vm3001_vm15, %v2435_v25, %v2433_v5  ;;  %v821_v17 = vadd.f32 %v2237_v37, %v797_v13  ;;  %v827_v22 = vadd.f32 %v2242_v61, %v803_v48  ;;  %vm3002_vm0 = vmmov %vm3001_vm15  ;;  %v3003_v55 = vmov %v2999_v24 }
 0x199   :  { %v826_v11 = vadd.f32 %v824_v32, %v802_v51  ;;  %v857_v19 = vsel %vm3002_vm0, %v2433_v5, %v2435_v25  ;;  %v849_v10 = vmul.f32 %v3003_v55, %v2070_v2  ;;  %v861_v30 = vstv %s2485_s6  ;;  %vm3006_vm2 = vmmov %vm3002_vm0  ;;  %s2784_s6 = sld [smem:[#allocation11 + $0x42]] }
 0x19a   :  { %v867_v58 = vstv %s2491_s30  ;;  %v873_v7 = vstv %s2501_s7  ;;  %v879_v37 = vstv %s2507_s22  ;;  %v832_v14 = vadd.f32 %v2245_v47, %v808_v45  ;;  %vm3007_vm11 = vmmov %vm3002_vm0  ;;  %s2789_s30 = sld [smem:[#allocation11 + $0x43]]  ;;  %s1461_s22 = smov [#allocation14]  }
 0x19b   :  { %v833_v61 = vadd.f32 %v2252_v34, %v809_v6  ;;  %vm3004_vm7 = vnez %v2890_v23  ;;  %v838_v5 = vadd.f32 %v2257_v8, %v814_v27  ;;  %v839_v25 = vadd.f32 %v837_v0, %v815_v44  ;;  %s2794_s7 = sld [smem:[#allocation11 + $0x46]]  ;;  %s1147_s24 = sshll.u32 %s1461_s22, 4  ;;  %s1148_s24 = int_to_ptr.vmem [resolvable:$true] %s1147_s24 }
 0x19c   :  { %v858_v21 = vsel %vm3004_vm7, %v856_v16, 0.0  ;;  %v844_v2 = vadd.f32 %v842_v60, %v820_v53  ;;  %vm3005_vm8 = vnez %v2892_v41  ;;  %v845_v46 = vadd.f32 %v843_v57, %v821_v17 }
 0x19d   :  { %v859_v20 = vsel %vm3005_vm8, %v857_v19, 0.0  ;;  %v2573_v59 = vadd.f32 %v848_v26, %v826_v11  ;;  %v2575_v50 = vadd.f32 %v849_v10, %v827_v22  ;;  %v888_v47 = vsel %vm3006_vm2, %v2477_v63, %v2481_v38 }
 0x19e   :  { %v862_v34 = vmul.f32 %v861_v30, %v858_v21  ;;  %v925_v8 = vstv %s2512_s26  ;;  %v931_v62 = vstv %s2517_s11  ;;  %v889_v29 = vsel %vm3007_vm11, %v2481_v38, %v2477_v63  ;;  %v983_v38 = vpop.permute.xlu0 %982  ;;  %v1013_v39 = vpop.permute.xlu1 %1012  ;;  %s3025_s11 = sld [smem:[#allocation32_spill]] }
 0x19f   :  { %v863_v33 = vmul.f32 %v861_v30, %v859_v20  ;;  %v868_v4 = vmul.f32 %v867_v58, %v858_v21  ;;  %v937_v1 = vstv %s2531_s18  ;;  %v943_v0 = vstv %s2542_s4  ;;  %s3026_s4 = smov 16  }
 0x1a0   :  { %vm3008_vm5 = vcmp.lt.s32.totalorder %v1613_v12, 113  ;;  %v893_v48 = vstv %s2549_s5  ;;  %v2604_v63 = vsel %vm3004_vm7, %v888_v47, 0.0  ;;  %v869_v31 = vmul.f32 %v867_v58, %v859_v20  ;;  %s3027_s5 = smov 256  }
 0x1a1   :  { %v920_v13 = vsel %vm3008_vm5, %v2487_v40, %v919_v28  ;;  %vm3009_vm6 = vmmov %vm3008_vm5  ;;  %v874_v56 = vmul.f32 %v873_v7, %v858_v21  ;;  %v899_v36 = vstv %s2557_s19  ;;  %v2609_v60 = vsel %vm3005_vm8, %v889_v29, 0.0 }
 0x1a2   :  { %v921_v51 = vsel %vm3009_vm6, %v919_v28, %v2487_v40  ;;  %v864_v42 = vadd.f32 %v862_v34, %v832_v14  ;;  %v875_v57 = vmul.f32 %v873_v7, %v859_v20  ;;  %v2611_v9 = vmul.f32 %v879_v37, %v858_v21  ;;  %v981_v40 = vpop.permute.xlu2 %980  ;;  %vm3012_vm12 = vmmov %vm3008_vm5 }
 0x1a3   :  { %v2613_v49 = vmul.f32 %v879_v37, %v859_v20  ;;  %v865_v23 = vadd.f32 %v863_v33, %v833_v61  ;;  %vm3010_vm1 = vnez %v2894_v43  ;;  %vm3011_vm14 = vnez %v2896_v18  ;;  %vm3013_vm13 = vmmov %vm3008_vm5 }
 0x1a4   :  { %v2619_v52 = vsel %vm3010_vm1, %v920_v13, 0.0  ;;  %v2623_v3 = vsel %vm3011_vm14, %v921_v51, 0.0  ;;  %v894_v41 = vmul.f32 %v893_v48, %v2604_v63  ;;  %v895_v24 = vmul.f32 %v893_v48, %v2609_v60  ;;  %s1149_s18 = sshll.u32 %s3025_s11, 4  ;;  %s1150_s18 = int_to_ptr.hbm [resolvable:$true] %s1149_s18 }
 0x1a5   :  { %v900_v26 = vmul.f32 %v899_v36, %v2604_v63  ;;  %v901_v45 = vmul.f32 %v899_v36, %v2609_v60  ;;  %v952_v6 = vsel %vm3012_vm12, %v2533_v54, %v951_v35  ;;  %v870_v32 = vadd.f32 %v868_v4, %v838_v5 }
 0x1a6   :  { %v871_v28 = vadd.f32 %v869_v31, %v839_v25  ;;  %v2634_v27 = vadd.f32 %v874_v56, %v844_v2  ;;  %v953_v44 = vsel %vm3013_vm13, %v951_v35, %v2533_v54  ;;  %v2641_v53 = vadd.f32 %v875_v57, %v845_v46  ;;  %v1045_v2 = vpop.permute.xlu0 %1044  ;;  %v1047_v57 = vpop.permute.xlu1 %1046 }
 0x1a7   :  { %v926_v16 = vmul.f32 %v925_v8, %v2619_v52  ;;  %v927_v17 = vmul.f32 %v925_v8, %v2623_v3  ;;  %v905_v11 = vstv %s2577_s0  ;;  %v896_v22 = vadd.f32 %v894_v41, %v864_v42 }
 0x1a8   :  { %v957_v19 = vstv %s2589_s12  ;;  %v963_v55 = vstv %s2593_s13  ;;  %v2652_v10 = vsel %vm3010_vm1, %v952_v6, 0.0  ;;  %v897_v54 = vadd.f32 %v895_v24, %v865_v23 }
 0x1a9   :  { %v902_v30 = vadd.f32 %v900_v26, %v870_v32  ;;  %v903_v58 = vadd.f32 %v901_v45, %v871_v28  ;;  %v2658_v7 = vsel %vm3011_vm14, %v953_v44, 0.0  ;;  %v932_v35 = vmul.f32 %v931_v62, %v2619_v52 }
 0x1aa   :  { %v933_v37 = vmul.f32 %v931_v62, %v2623_v3  ;;  %vm3014_vm15 = vcmp.lt.s32.totalorder %v1613_v12, 112  ;;  %v958_v61 = vmul.f32 %v957_v19, %v2652_v10  ;;  %v989_v21 = vstv %s2615_s14  ;;  %v1015_v8 = vpop.permute.xlu2 %1014 }
 0x1ab   :  { %v984_v43 = vsel %vm3014_vm15, %v981_v40, %v983_v38  ;;  %vm3015_vm0 = vmmov %vm3014_vm15  ;;  %v959_v20 = vmul.f32 %v957_v19, %v2658_v7  ;;  %v964_v46 = vmul.f32 %v963_v55, %v2652_v10  ;;  %v965_v47 = vmul.f32 %v963_v55, %v2658_v7 }
 0x1ac   :  { %v985_v14 = vsel %vm3015_vm0, %v983_v38, %v981_v40  ;;  %v2672_v18 = vsel %vm1961_vm4, %v984_v43, 0.0  ;;  %v995_v34 = vstv %s2626_s15  ;;  %v928_v62 = vadd.f32 %v926_v16, %v896_v22  ;;  %vm3017_vm7 = vmmov %vm3015_vm0 }
 0x1ad   :  { %v2676_v25 = vsel %vm1965_vm3, %v985_v14, 0.0  ;;  %v929_v29 = vadd.f32 %v927_v17, %v897_v54  ;;  %v934_v33 = vadd.f32 %v932_v35, %v902_v30  ;;  %v935_v4 = vadd.f32 %v933_v37, %v903_v58  ;;  %vm3018_vm8 = vmmov %vm3015_vm0 }
 0x1ae   :  { %v1016_v13 = vsel %vm3017_vm7, %v1013_v39, %v1015_v8  ;;  %v1017_v51 = vsel %vm3018_vm8, %v1015_v8, %v1013_v39  ;;  %v990_v48 = vmul.f32 %v989_v21, %v2672_v18  ;;  %v991_v38 = vmul.f32 %v989_v21, %v2676_v25  ;;  %v1079_v5 = vpop.permute.xlu0 %1078 }
 0x1af   :  { %v1021_v31 = vstv %s2639_s16  ;;  %v1027_v56 = vstv %s2646_s17  ;;  %v996_v36 = vmul.f32 %v995_v34, %v2672_v18  ;;  %v997_v42 = vmul.f32 %v995_v34, %v2676_v25 }
 0x1b0   :  { %v960_v40 = vadd.f32 %v958_v61, %v928_v62  ;;  %v961_v23 = vadd.f32 %v959_v20, %v929_v29  ;;  %v966_v41 = vadd.f32 %v964_v46, %v934_v33  ;;  %v967_v24 = vadd.f32 %v965_v47, %v935_v4 }
 0x1b1   :  { %v2700_v26 = vsel %vm1961_vm4, %v1016_v13, 0.0  ;;  %v2704_v45 = vsel %vm1965_vm3, %v1017_v51, 0.0  ;;  %v1053_v6 = vstv %s2654_s1  ;;  %v1059_v39 = vstv %s2660_s23 }
 0x1b2   :  { %v992_v32 = vadd.f32 %v990_v48, %v960_v40  ;;  %v993_v28 = vadd.f32 %v991_v38, %v961_v23  ;;  %vm3019_vm2 = vcmp.lt.s32.totalorder %v1613_v12, 111  ;;  %v998_v17 = vadd.f32 %v996_v36, %v966_v41  ;;  %v1077_v34 = vpop.permute.xlu2 %1076 }
 0x1b3   :  { %v1048_v44 = vsel %vm3019_vm2, %v1045_v2, %v1047_v57  ;;  %vm3020_vm11 = vmmov %vm3019_vm2  ;;  %v999_v15 = vadd.f32 %v997_v42, %v967_v24  ;;  %v1022_v30 = vmul.f32 %v1021_v31, %v2700_v26  ;;  %v1023_v58 = vmul.f32 %v1021_v31, %v2704_v45 }
 0x1b4   :  { %v1049_v16 = vsel %vm3020_vm11, %v1047_v57, %v1045_v2  ;;  %v2714_v19 = vsel %vm2019_vm9, %v1048_v44, 0.0  ;;  %v1028_v43 = vmul.f32 %v1027_v56, %v2700_v26  ;;  %v1029_v14 = vmul.f32 %v1027_v56, %v2704_v45  ;;  %vm3023_vm3 = vmmov %vm3019_vm2 }
 0x1b5   :  { %v2718_v54 = vsel %vm2023_vm10, %v1049_v16, 0.0  ;;  %v1054_v35 = vmul.f32 %v1053_v6, %v2714_v19  ;;  %v1060_v61 = vmul.f32 %v1059_v39, %v2714_v19  ;;  %v911_v2 = vstv %s2682_s20  ;;  %vm3024_vm4 = vmmov %vm3019_vm2 }
 0x1b6   :  { %v1055_v37 = vmul.f32 %v1053_v6, %v2718_v54  ;;  %v1061_v21 = vmul.f32 %v1059_v39, %v2718_v54  ;;  %v906_v20 = vmul.f32 %v905_v11, %v2604_v63  ;;  %v1024_v46 = vadd.f32 %v1022_v30, %v992_v32 }
 0x1b7   :  { %v1025_v47 = vadd.f32 %v1023_v58, %v993_v28  ;;  %v1030_v8 = vadd.f32 %v1028_v43, %v998_v17  ;;  %v1031_v62 = vadd.f32 %v1029_v14, %v999_v15  ;;  %v1085_v29 = vstv %s2690_s27 }
 0x1b8   :  { %v1091_v33 = vstv %s2696_s28  ;;  %v1056_v4 = vadd.f32 %v1054_v35, %v1024_v46  ;;  %v1080_v51 = vsel %vm3023_vm3, %v1077_v34, %v1079_v5  ;;  %v1081_v48 = vsel %vm3024_vm4, %v1079_v5, %v1077_v34 }
 0x1b9   :  { %v1057_v13 = vadd.f32 %v1055_v37, %v1025_v47  ;;  %v1062_v38 = vadd.f32 %v1060_v61, %v1030_v8  ;;  %v1063_v31 = vadd.f32 %v1061_v21, %v1031_v62  ;;  %v2746_v56 = vsel %vm2019_vm9, %v1080_v51, 0.0 }
 0x1ba   :  { %v2750_v36 = vsel %vm2023_vm10, %v1081_v48, 0.0  ;;  %v1086_v42 = vmul.f32 %v1085_v29, %v2746_v56  ;;  %v1092_v57 = vmul.f32 %v1091_v33, %v2746_v56  ;;  %v882_v23 = vadd.f32 %v2611_v9, %v2573_v59 }
 0x1bb   :  { %v1087_v12 = vmul.f32 %v1085_v29, %v2750_v36  ;;  %v1093_v40 = vmul.f32 %v1091_v33, %v2750_v36  ;;  %v907_v41 = vmul.f32 %v905_v11, %v2609_v60  ;;  %v912_v24 = vmul.f32 %v911_v2, %v2604_v63 }
 0x1bc   :  { %v913_v6 = vmul.f32 %v911_v2, %v2609_v60  ;;  %v1088_v39 = vadd.f32 %v1086_v42, %v1056_v4  ;;  %v1094_v28 = vadd.f32 %v1092_v57, %v1062_v38  ;;  %v883_v16 = vadd.f32 %v2613_v49, %v2575_v50 }
 0x1bd   :  { %v1089_v32 = vadd.f32 %v1087_v12, %v1057_v13  ;;  %v1095_v44 = vadd.f32 %v1093_v40, %v1063_v31  ;;  %v938_v59 = vmul.f32 %v937_v1, %v2619_v52  ;;  %v939_v63 = vmul.f32 %v937_v1, %v2623_v3 }
 0x1be   :  { %v969_v9 = vstv %s2724_s29  ;;  %v908_v60 = vadd.f32 %v906_v20, %v2634_v27  ;;  %v1108_v11 = vmul.f32 0.5, %v1088_v39  ;;  %v1120_v15 = vmul.f32 0.5, %v1094_v28 }
 0x1bf   :  { %v1109_v17 = vmul.f32 0.5, %v1089_v32  ;;  %v944_v22 = vmul.f32 %v943_v0, %v2619_v52  ;;  %v909_v50 = vadd.f32 %v907_v41, %v2641_v53  ;;  %v975_v49 = vstv %s2734_s8 }
 0x1c0   :  { %v1121_v55 = vmul.f32 0.5, %v1095_v44  ;;  %v945_v1 = vmul.f32 %v943_v0, %v2623_v3  ;;  %v914_v30 = vadd.f32 %v912_v24, %v882_v23  ;;  %v915_v27 = vadd.f32 %v913_v6, %v883_v16 }
 0x1c1   :  { %1293 = vtanh.f32 %v1108_v11  ;;  %v970_v58 = vmul.f32 %v969_v9, %v2652_v10  ;;  %v971_v52 = vmul.f32 %v969_v9, %v2658_v7  ;;  %v1001_v35 = vstv %s2742_s3 }
 0x1c2   :  { %1295 = vtanh.f32 %v1109_v17  ;;  %v940_v53 = vadd.f32 %v938_v59, %v908_v60  ;;  %v976_v37 = vmul.f32 %v975_v49, %v2652_v10  ;;  %v977_v0 = vmul.f32 %v975_v49, %v2658_v7 }
 0x1c3   :  { %1297 = vtanh.f32 %v1120_v15  ;;  %v941_v3 = vadd.f32 %v939_v63, %v909_v50  ;;  %v1033_v43 = vstv %s2752_s9  ;;  %v1007_v14 = vstv %s2765_s2 }
 0x1c4   :  { %1299 = vtanh.f32 %v1121_v55  ;;  %v946_v61 = vadd.f32 %v944_v22, %v914_v30  ;;  %v947_v21 = vadd.f32 %v945_v1, %v915_v27  ;;  %v1002_v5 = vmul.f32 %v1001_v35, %v2672_v18  ;;  %v1309_v30 = vld [vmem:[#allocation6 + $0x20] sm:$0xff] }
 0x1c5   :  { %v972_v2 = vadd.f32 %v970_v58, %v940_v53  ;;  %v973_v20 = vadd.f32 %v971_v52, %v941_v3  ;;  %v1039_v46 = vstv %s2776_s10  ;;  %v1003_v10 = vmul.f32 %v1001_v35, %v2676_v25  ;;  %v1311_v3 = vld [vmem:[#allocation6 + $0x30] sm:$0xff] }
 0x1c6   :  { %v978_v7 = vadd.f32 %v976_v37, %v946_v61  ;;  %v979_v34 = vadd.f32 %v977_v0, %v947_v21  ;;  %v1034_v8 = vmul.f32 %v1033_v43, %v2700_v26  ;;  %v1008_v62 = vmul.f32 %v1007_v14, %v2672_v18 }
 0x1c7   :  { %v1294_v47 = vpop.eup %1293  ;;  %v1035_v33 = vmul.f32 %v1033_v43, %v2704_v45  ;;  %v1009_v4 = vmul.f32 %v1007_v14, %v2676_v25  ;;  %v1065_v13 = vstv %s2784_s6  ;;  %v1040_v38 = vmul.f32 %v1039_v46, %v2700_v26  ;;  %v1312_v14 = vld [vmem:[#allocation6 + $0x38] sm:$0xff] }
 0x1c8   :  { %v1296_v29 = vpop.eup %1295  ;;  %v1112_v51 = vmul.f32 1.442695, %v1294_v47  ;;  %v1004_v31 = vadd.f32 %v1002_v5, %v972_v2  ;;  %v1071_v42 = vstv %s2789_s30  ;;  %v1005_v40 = vadd.f32 %v1003_v10, %v973_v20 }
 0x1c9   :  { %v1298_v48 = vpop.eup %1297  ;;  %v1114_v12 = vmul.f32 1.442695, %v1296_v29  ;;  %v1097_v23 = vstv %s2794_s7  ;;  %v1010_v18 = vadd.f32 %v1008_v62, %v978_v7  ;;  %v1066_v24 = vmul.f32 %v1065_v13, %v2714_v19 }
 0x1ca   :  { %v1300_v57 = vpop.eup %1299  ;;  %1301 = vpow2.f32 %v1112_v51  ;;  %v1124_v41 = vmul.f32 1.442695, %v1298_v48  ;;  %v1011_v25 = vadd.f32 %v1009_v4, %v979_v34  ;;  %v1067_v39 = vmul.f32 %v1065_v13, %v2718_v54 }
 0x1cb   :  { %1303 = vpow2.f32 %v1114_v12  ;;  %v1126_v6 = vmul.f32 1.442695, %v1300_v57  ;;  %v1103_v32 = vstv %s2800_s21  ;;  %v1036_v28 = vadd.f32 %v1034_v8, %v1004_v31 }
 0x1cc   :  { %1305 = vpow2.f32 %v1124_v41  ;;  %v1072_v26 = vmul.f32 %v1071_v42, %v2714_v19  ;;  %v1098_v44 = vmul.f32 %v1097_v23, %v2746_v56  ;;  %v1041_v16 = vmul.f32 %v1039_v46, %v2704_v45 }
 0x1cd   :  { %1307 = vpow2.f32 %v1126_v6  ;;  %v1037_v59 = vadd.f32 %v1035_v33, %v1005_v40  ;;  %v1073_v63 = vmul.f32 %v1071_v42, %v2718_v54  ;;  %v1099_v9 = vmul.f32 %v1097_v23, %v2750_v36  ;;  %v1310_v54 = vld [vmem:[#allocation6 + $0x28] sm:$0xff] }
 0x1ce   :  { %v1042_v60 = vadd.f32 %v1040_v38, %v1010_v18  ;;  %v1068_v11 = vadd.f32 %v1066_v24, %v1036_v28  ;;  %v1104_v17 = vmul.f32 %v1103_v32, %v2746_v56  ;;  %v1043_v22 = vadd.f32 %v1041_v16, %v1011_v25 }
 0x1cf   :  { %v1069_v50 = vadd.f32 %v1067_v39, %v1037_v59  ;;  %v1105_v49 = vmul.f32 %v1103_v32, %v2750_v36 }
 0x1d0   :  { %v1302_v15 = vpop.eup %1301  ;;  %v1074_v55 = vadd.f32 %v1072_v26, %v1042_v60  ;;  %v1100_v1 = vadd.f32 %v1098_v44, %v1068_v11  ;;  %v1075_v58 = vadd.f32 %v1073_v63, %v1043_v22 }
 0x1d1   :  { %v1304_v19 = vpop.eup %1303  ;;  %v1116_v27 = vmul.f32 %v1309_v30, %v1302_v15  ;;  %v1101_v52 = vadd.f32 %v1099_v9, %v1069_v50 }
 0x1d2   :  { %v1306_v45 = vpop.eup %1305  ;;  %v1117_v35 = vmul.f32 %v1310_v54, %v1304_v19  ;;  %v1106_v37 = vadd.f32 %v1104_v17, %v1074_v55  ;;  %v1107_v36 = vadd.f32 %v1105_v49, %v1075_v58 }
 0x1d3   :  { %v1308_v53 = vpop.eup %1307  ;;  %v1118_v0 = vadd.f32 %v1116_v27, %v1100_v1  ;;  %v1128_v56 = vmul.f32 %v1311_v3, %v1306_v45 }
 0x1d4   :  { %v1119_v43 = vadd.f32 %v1117_v35, %v1101_v52  ;;  %v1129_v61 = vmul.f32 %v1312_v14, %v1308_v53 }
 0x1d5   :  { %v1130_v21 = vadd.f32 %v1128_v56, %v1106_v37  ;;  %1138 = vst [vmem:[#allocation14 + $0x20] sm:$0xff] %v1118_v0 }
 0x1d6   :  { %v1131_v5 = vadd.f32 %v1129_v61, %v1107_v36  ;;  %1139 = vst [vmem:[#allocation14 + $0x28] sm:$0xff] %v1119_v43 }
 0x1d7   :  { %1141 = vst [vmem:[#allocation14 + $0x30] sm:$0xff] %v1130_v21 }
 0x1d8   :  { %1142 = vst [vmem:[#allocation14 + $0x38] sm:$0xff] %v1131_v5 }
 0x1d9   :  { %1155 = dma.vmem_to_hbm [thread:$0]  %s1148_s24, 1024, %s1150_s18, [#allocation4], %s3027_s5, %s3027_s5, %s3026_s4  }
 0x1da   :  { %1443 = dma.done.wait [#allocation4], 1024  }
 0x1db   :  { %1444 = vsyncadd [#allocation4], 4294966272 }
 0x1dc   :  { %1160 = vsyncpa [#allocation3], 1 }
 0x1dd   :  { %1161 = vsyncpa [#allocation7], 1 }
 0x1de   :  { %1162 = vsyncpa [#allocation4], 1 }
 0x1df   :  { %1163 = vsyncpa [#allocation5], 1 }
 0x1e0   :  { %1164 = vsyncpa [#allocation10], 1 }
 0x1e1   :  { %1165 = vsyncpa [#allocation13], 1 }

</bundles_post_ra>
